<compile_context>
chip_gen: v7x
topology: tpu7x:2x2x1
jax: 0.10.0
libtpu: 0.0.40
codegen_flags: <defaults>
</compile_context>

<pallas_src>
import functools
import math

import jax
import jax.numpy as jnp
from jax.experimental import pallas as pl
from jax.experimental.pallas import tpu as pltpu

_NBINS = 32            # cumulative-histogram edges emitted by kernel 1 (33 counts/tile)
_REFINE_LEVELS = 6     # bisection refinement levels for the exact-ish k-th NLL (case B)
_REFINE_Q = 16         # branching factor per refinement level


# ----------------------- kernel 1: per-pixel NLL + per-tile stats -----------------------
def _nll_stats_kernel(x_ref, t_ref, nll_ref, stats_ref, *, ignore_index, h, tile_h, edges):
    """x_ref: (C, TH, W) logits; t_ref: (TH, W) labels.

    Writes:
      nll_ref  (TH, W) : -log_softmax[GT] (clamped >= 0) for valid pixels, -1.0 sentinel
                         for ignore_index / out-of-bounds rows.
      stats_ref (1,128): lane j (j <= NBINS) = count(valid & nll >= edges[j]) for this
                         tile; lane 0 == #valid, lane NBINS == #(GT prob <= thresh).
    """
    c = x_ref.shape[0]
    hi = pl.program_id(1)
    t = t_ref[...].astype(jnp.int32)

    # mask ignore_index pixels and ragged / out-of-bounds rows of the last H tile
    row = jax.lax.broadcasted_iota(jnp.int32, t.shape, 0) + hi * tile_h
    valid = jnp.logical_and(t != ignore_index, row < h)
    tc = jnp.where(valid, t, 0)

    # pass 1: running max over classes (no (C,TH,W) f32 temporaries)
    xmax = x_ref[0].astype(jnp.float32)
    for cc in range(1, c):
        xmax = jnp.maximum(xmax, x_ref[cc].astype(jnp.float32))

    # pass 2: softmax denominator + masked-select gather of the GT logit
    denom = jnp.zeros(t.shape, jnp.float32)
    x_t = jnp.zeros(t.shape, jnp.float32)
    for cc in range(c):
        xc = x_ref[cc].astype(jnp.float32)
        denom = denom + jnp.exp(xc - xmax)
        x_t = jnp.where(tc == cc, xc, x_t)

    nll = jnp.maximum(xmax + jnp.log(denom) - x_t, 0.0)        # -log_softmax[GT] >= 0
    stored = jnp.where(valid, nll, -1.0)                       # sentinel for ignored/padded
    nll_ref[...] = stored

    # fused cumulative histogram: count(valid & nll >= edge_j) for 33 static edges.
    # `stored` already encodes validity (sentinel -1 < 0 <= edge_j), so one compare each.
    lane = jax.lax.broadcasted_iota(jnp.int32, (1, 128), 1)
    stats = jnp.zeros((1, 128), jnp.float32)
    for j, e in enumerate(edges):
        cnt = jnp.sum((stored >= e).astype(jnp.float32))
        stats = stats + jnp.where(lane == j, cnt, 0.0)
    stats_ref[...] = stats


# --------------------------- kernel 2: masked partial reduction --------------------------
def _ohem_reduce_kernel(thr_ref, nll_ref, out_ref, *, h, tile_h):
    """thr_ref: (1,1) f32 in SMEM; nll_ref: (TH2, W) NLL tile; out_ref: (1,128) partials."""
    hi = pl.program_id(1)
    thr = thr_ref[0, 0]
    v = nll_ref[...]
    row = jax.lax.broadcasted_iota(jnp.int32, v.shape, 0) + hi * tile_h
    kept = jnp.logical_and(v >= thr, row < h)                  # sentinel -1 < 0 <= thr
    s = jnp.sum(jnp.where(kept, v, 0.0))                       # where(): no NaN leakage
    cnt = jnp.sum(kept.astype(jnp.float32))
    lane = jax.lax.broadcasted_iota(jnp.int32, (1, 128), 1)
    out_ref[...] = jnp.where(lane == 0, s, 0.0) + jnp.where(lane == 1, cnt, 0.0)


# ----------------------------------- forward wrapper -------------------------------------
@functools.partial(jax.jit, static_argnames=("ignore_index", "thresh", "min_kept"))
def _ohem_forward(logits, target, *, ignore_index, thresh, min_kept):
    b, c, h, w = logits.shape
    thresh_c = float(min(max(float(thresh), 1e-8), 1.0))
    nll_thresh = float(-math.log(thresh_c))                    # prob <= thresh  <=>  nll >= this
    edges = tuple(nll_thresh * j / _NBINS for j in range(_NBINS + 1))

    # ---- kernel 1 tile sizing: budget the real per-step working set ----
    try:
        vmem_cap = int(pltpu.get_tpu_info().vmem_capacity_bytes)
    except Exception:                                          # conservative fallback (v7x: 64 MiB)
        vmem_cap = 64 << 20
    ws_budget = max(2 << 20, min(20 << 20, vmem_cap // 3))
    vmem_limit = int(min(vmem_cap // 2, max(2 * ws_budget, 16 << 20)))
    # per H-row bytes ~ double-buffered (C,.,W) f32 input + ~6 live (.,W) f32 temporaries
    # + double-buffered target / NLL blocks (counted as 12 extra 4*W rows of slack).
    bytes_per_row = 4 * w * (2 * c + 12)
    if h % 8 == 0:
        th = max(8, min(h, (ws_budget // bytes_per_row) // 8 * 8))
        # keep >= ~8 parallel grid steps so megacore chips (v7x) use both TensorCores
        g_min = -(-8 // b)
        th = max(8, min(th, max(8, (h // max(g_min, 1)) // 8 * 8)))
    else:
        th = h   # full-extent block is always legal. TODO(synk): smarter tiling for ragged H.
    grid_h = pl.cdiv(h, th)
    steps1 = b * grid_h

    kernel1 = functools.partial(_nll_stats_kernel, ignore_index=int(ignore_index),
                                h=h, tile_h=th, edges=edges)
    nll, stats = pl.pallas_call(
        kernel1,
        out_shape=(jax.ShapeDtypeStruct((b, h, w), jnp.float32),
                   jax.ShapeDtypeStruct((1, steps1 * 128), jnp.float32)),
        grid_spec=pltpu.PrefetchScalarGridSpec(
            num_scalar_prefetch=0,
            grid=(b, grid_h),
            in_specs=[pl.BlockSpec((None, c, th, w), lambda bi, hi: (bi, 0, hi, 0)),
                      pl.BlockSpec((None, th, w), lambda bi, hi: (bi, hi, 0))],
            out_specs=[pl.BlockSpec((None, th, w), lambda bi, hi: (bi, hi, 0)),
                       pl.BlockSpec((1, 128), lambda bi, hi: (0, bi * grid_h + hi))]),
        compiler_params=pltpu.CompilerParams(
            dimension_semantics=("parallel", "parallel"),
            vmem_limit_bytes=vmem_limit),
    )(logits, target)

    # ---- OHEM threshold (NLL space; kept <=> nll >= nll_thr) ----
    # Counts are exact integers held in f32 (fine up to ~16M pixels). TODO(synk): int stats
    # for >16M-pixel batches.
    cnt_ge = jnp.sum(stats.reshape(steps1, 128), axis=0)[: _NBINS + 1]
    num_valid = cnt_ge[0]                 # emitted by kernel 1 — no extra pass over targets
    hard = cnt_ge[_NBINS]                 # #(GT prob <= thresh) among valid pixels

    if int(min_kept) <= 0:
        # PyTorch applies no hard-example filtering at all when min_kept == 0.
        nll_thr = jnp.asarray(0.0, jnp.float32)
    else:
        k = int(min_kept)
        kf = jnp.float32(k)
        edges_arr = jnp.asarray(edges, jnp.float32)
        nll_flat = nll.reshape(-1)

        def _keep_all():
            return jnp.asarray(0.0, jnp.float32)               # keep every valid pixel

        def _ohem():
            def _case_thresh():                                # k-th smallest GT prob <= thresh
                return jnp.asarray(nll_thresh, jnp.float32)

            def _case_kth():
                # k-th smallest GT prob > thresh: locate the crossing histogram bin, then
                # refine by bisection over the NLL slab (invariant: count(>=lo) >= k > count(>=hi)).
                j_star = jnp.sum((cnt_ge[1:] >= kf).astype(jnp.int32))
                lo0 = edges_arr[j_star]
                hi0 = edges_arr[j_star + 1]

                def _level(_, carry):
                    lo, hi_ = carry
                    cand = lo + (hi_ - lo) * (
                        jnp.arange(1, _REFINE_Q, dtype=jnp.float32) / _REFINE_Q)
                    cnts = jnp.sum((nll_flat[None, :] >= cand[:, None]).astype(jnp.int32),
                                   axis=1)
                    m = jnp.sum((cnts >= k).astype(jnp.int32))  # prefix length of "count >= k"
                    new_lo = jnp.where(m > 0, cand[jnp.maximum(m - 1, 0)], lo)
                    new_hi = jnp.where(m < _REFINE_Q - 1,
                                       cand[jnp.minimum(m, _REFINE_Q - 2)], hi_)
                    return new_lo, new_hi

                lo, _ = jax.lax.fori_loop(0, _REFINE_LEVELS, _level, (lo0, hi0))
                return lo                                       # <= k-th value, within ~1e-9

            return jax.lax.cond(hard >= kf, _case_thresh, _case_kth)

        apply_ohem = jnp.logical_and(num_valid > 0.0, num_valid >= kf)
        nll_thr = jax.lax.cond(apply_ohem, _ohem, _keep_all)

    thr_arr = jnp.full((1, 1), nll_thr, jnp.float32)

    # ---- kernel 2: masked partial sums over the NLL slab (large natural-shape blocks) ----
    if h % 8 == 0:
        th2 = max(8, min(h, ((4 << 20) // (4 * w)) // 8 * 8))
    else:
        th2 = h
    grid_h2 = pl.cdiv(h, th2)
    steps2 = b * grid_h2
    kernel2 = functools.partial(_ohem_reduce_kernel, h=h, tile_h=th2)
    partials = pl.pallas_call(
        kernel2,
        out_shape=jax.ShapeDtypeStruct((1, steps2 * 128), jnp.float32),
        grid_spec=pltpu.PrefetchScalarGridSpec(
            num_scalar_prefetch=0,
            grid=(b, grid_h2),
            in_specs=[pl.BlockSpec((1, 1), lambda bi, hi: (0, 0),
                                   memory_space=pltpu.MemorySpace.SMEM),
                      pl.BlockSpec((None, th2, w), lambda bi, hi: (bi, hi, 0))],
            out_specs=pl.BlockSpec((1, 128), lambda bi, hi: (0, bi * grid_h2 + hi))),
        compiler_params=pltpu.CompilerParams(
            dimension_semantics=("parallel", "parallel"),
            vmem_limit_bytes=vmem_limit),
    )(thr_arr, nll)

    parts = partials.reshape(steps2, 128)
    loss_sum = jnp.sum(parts[:, 0])
    kept_cnt = jnp.sum(parts[:, 1])
    # reduction='mean' over kept pixels; kept_cnt == 0 (everything ignored) -> NaN, like PyTorch.
    return loss_sum / kept_cnt


class OhemCrossEntropyLoss:
    """JAX/Pallas port of TFNet/CFENet OhemCrossEntropyLoss (forward only)."""

    def __init__(self, ignore_index=255, thresh=0.7, min_kept=10000,
                 reduction='mean', ce_weight=None):
        assert reduction == 'mean'      # TODO(synk): only 'mean' reduction implemented
        assert ce_weight is None        # TODO(synk): per-class ce_weight not implemented
        self.ignore_index = int(ignore_index)
        self.thresh = float(thresh)
        self.min_kept = int(min_kept)

    def __call__(self, input, target):
        # input: (B, C, H, W) float logits; target: (B, H, W) int labels
        return _ohem_forward(input, target,
                             ignore_index=self.ignore_index,
                             thresh=self.thresh,
                             min_kept=self.min_kept)


# ---------------- pure-JAX reference (mirrors the PyTorch module) ----------------
def _reference_ohem_ce(logits, target, ignore_index, thresh, min_kept):
    b, c = logits.shape[:2]
    tgt = target.reshape(-1)
    valid = tgt != ignore_index
    tgt0 = jnp.where(valid, tgt, 0)
    num_valid = jnp.sum(valid.astype(jnp.int32))

    prob = jax.nn.softmax(logits.astype(jnp.float32), axis=1)
    prob = jnp.transpose(prob, (1, 0, 2, 3)).reshape(c, -1)
    prob = jnp.where(valid[None, :], prob, 1.0)
    mask_prob = prob[tgt0, jnp.arange(tgt.shape[0])]

    kept = jnp.ones_like(valid)
    if int(min_kept) > 0:
        k = min(tgt.shape[0], int(min_kept))
        kth = jnp.sort(mask_prob)[k - 1]
        thr = jnp.maximum(kth, jnp.float32(thresh))
        apply = jnp.logical_and(num_valid > 0, num_valid >= min_kept)
        kept = jnp.where(apply, mask_prob <= thr, True)
    final_valid = jnp.logical_and(valid, kept)

    logp = jax.nn.log_softmax(logits.astype(jnp.float32), axis=1)
    logp = jnp.transpose(logp, (1, 0, 2, 3)).reshape(c, -1)
    nll = -logp[tgt0, jnp.arange(tgt.shape[0])]
    cnt = jnp.sum(final_valid.astype(jnp.float32))
    return jnp.sum(jnp.where(final_valid, nll, 0.0)) / cnt


if __name__ == "__main__":
    key = jax.random.PRNGKey(0)
    k1, k2, k3, k4 = jax.random.split(key, 4)

    B, C, H, W = 2, 4, 16, 16
    IGNORE = 255

    # config 1: diffuse logits -> k-th smallest GT prob <= thresh (threshold = thresh path)
    logits1 = jax.random.normal(k1, (B, C, H, W), dtype=jnp.float32)
    target1 = jax.random.randint(k2, (B, H, W), 0, C).astype(jnp.int32)
    ignore_mask = jax.random.uniform(k3, (B, H, W)) < 0.1
    target1 = jnp.where(ignore_mask, IGNORE, target1)

    # config 2: confident logits with GT = argmax -> exercises the k-th-value refinement path
    logits2 = 3.0 * jax.random.normal(k4, (B, C, H, W), dtype=jnp.float32)
    target2 = jnp.argmax(logits2, axis=1).astype(jnp.int32)
    target2 = jnp.where(ignore_mask, IGNORE, target2)

    configs = [
        (logits1, target1, dict(ignore_index=IGNORE, thresh=0.7, min_kept=100)),
        (logits2, target2, dict(ignore_index=IGNORE, thresh=0.7, min_kept=256)),
        (logits1, target1, dict(ignore_index=IGNORE, thresh=0.7, min_kept=0)),
    ]
    for logits, target, cfg in configs:
        loss_fn = OhemCrossEntropyLoss(**cfg)
        loss = jax.block_until_ready(loss_fn(logits, target))
        ref = jax.block_until_ready(
            _reference_ohem_ce(logits, target, cfg["ignore_index"],
                               cfg["thresh"], cfg["min_kept"]))
        assert bool(jnp.isfinite(loss)), f"loss is not finite for {cfg}"
        assert jnp.allclose(loss, ref, rtol=1e-3, atol=1e-5), (cfg, loss, ref)
    print("KERNEL_OK")
</pallas_src>

<mosaic_0001>
module attributes {stable_mosaic.version = 11 : i64} {
  func.func @_nll_stats_kernel(%arg0: i32, %arg1: i32, %arg2: memref<1x4x8x16xf32, #tpu.memory_space<vmem>>, %arg3: memref<1x8x16xi32, #tpu.memory_space<vmem>>, %arg4: memref<1x8x16xf32, #tpu.memory_space<vmem>>, %arg5: memref<1x128xf32, #tpu.memory_space<vmem>>) attributes {dimension_semantics = [#tpu.dimension_semantics<parallel>, #tpu.dimension_semantics<parallel>], iteration_bounds = array<i64: 2, 2>, scalar_prefetch = 0 : i64, scratch_operands = 0 : i64, tpu.core_type = #tpu.core_type<tc>, window_params = [{transform_indices = @transform_0, window_bounds = array<i64: 1, 4, 8, 16>}, {transform_indices = @transform_1, window_bounds = array<i64: 1, 8, 16>}, {transform_indices = @transform_2, window_bounds = array<i64: 1, 8, 16>}, {transform_indices = @transform_3, window_bounds = array<i64: 1, 128>}]} {
    %c0 = arith.constant 0 : index
    %c0_0 = arith.constant 0 : index
    %c0_1 = arith.constant 0 : index
    %0 = vector.load %arg3[%c0, %c0_0, %c0_1] : memref<1x8x16xi32, #tpu.memory_space<vmem>>, vector<1x8x16xi32>
    %1 = vector.shape_cast %0 : vector<1x8x16xi32> to vector<8x16xi32>
    %2 = tpu.iota {dimensions = array<i32: 0>} : vector<8x16xi32>
    %c8_i32 = arith.constant 8 : i32
    %3 = arith.muli %arg1, %c8_i32 : i32
    %4 = vector.broadcast %3 : i32 to vector<8x16xi32>
    %5 = arith.addi %2, %4 : vector<8x16xi32>
    %c255_i32 = arith.constant 255 : i32
    %6 = vector.broadcast %c255_i32 : i32 to vector<8x16xi32>
    %7 = arith.cmpi ne, %1, %6 : vector<8x16xi32>
    %c16_i32 = arith.constant 16 : i32
    %8 = vector.broadcast %c16_i32 : i32 to vector<8x16xi32>
    %9 = arith.cmpi slt, %5, %8 : vector<8x16xi32>
    %10 = arith.andi %7, %9 : vector<8x16xi1>
    %c0_i32 = arith.constant 0 : i32
    %11 = vector.broadcast %c0_i32 : i32 to vector<8x16xi32>
    %12 = arith.select %10, %1, %11 : vector<8x16xi1>, vector<8x16xi32>
    %c0_2 = arith.constant 0 : index
    %c0_3 = arith.constant 0 : index
    %c0_4 = arith.constant 0 : index
    %c0_5 = arith.constant 0 : index
    %13 = vector.load %arg2[%c0_2, %c0_3, %c0_4, %c0_5] : memref<1x4x8x16xf32, #tpu.memory_space<vmem>>, vector<1x1x8x16xf32>
    %14 = vector.shape_cast %13 : vector<1x1x8x16xf32> to vector<8x16xf32>
    %c0_6 = arith.constant 0 : index
    %c1 = arith.constant 1 : index
    %c0_7 = arith.constant 0 : index
    %c0_8 = arith.constant 0 : index
    %15 = vector.load %arg2[%c0_6, %c1, %c0_7, %c0_8] : memref<1x4x8x16xf32, #tpu.memory_space<vmem>>, vector<1x1x8x16xf32>
    %16 = vector.shape_cast %15 : vector<1x1x8x16xf32> to vector<8x16xf32>
    %17 = arith.maximumf %14, %16 : vector<8x16xf32>
    %c0_9 = arith.constant 0 : index
    %c2 = arith.constant 2 : index
    %c0_10 = arith.constant 0 : index
    %c0_11 = arith.constant 0 : index
    %18 = vector.load %arg2[%c0_9, %c2, %c0_10, %c0_11] : memref<1x4x8x16xf32, #tpu.memory_space<vmem>>, vector<1x1x8x16xf32>
    %19 = vector.shape_cast %18 : vector<1x1x8x16xf32> to vector<8x16xf32>
    %20 = arith.maximumf %17, %19 : vector<8x16xf32>
    %c0_12 = arith.constant 0 : index
    %c3 = arith.constant 3 : index
    %c0_13 = arith.constant 0 : index
    %c0_14 = arith.constant 0 : index
    %21 = vector.load %arg2[%c0_12, %c3, %c0_13, %c0_14] : memref<1x4x8x16xf32, #tpu.memory_space<vmem>>, vector<1x1x8x16xf32>
    %22 = vector.shape_cast %21 : vector<1x1x8x16xf32> to vector<8x16xf32>
    %23 = arith.maximumf %20, %22 : vector<8x16xf32>
    %cst = arith.constant 0.000000e+00 : f32
    %24 = vector.broadcast %cst : f32 to vector<8x16xf32>
    %cst_15 = arith.constant 0.000000e+00 : f32
    %25 = vector.broadcast %cst_15 : f32 to vector<8x16xf32>
    %c0_16 = arith.constant 0 : index
    %c0_17 = arith.constant 0 : index
    %c0_18 = arith.constant 0 : index
    %c0_19 = arith.constant 0 : index
    %26 = vector.load %arg2[%c0_16, %c0_17, %c0_18, %c0_19] : memref<1x4x8x16xf32, #tpu.memory_space<vmem>>, vector<1x1x8x16xf32>
    %27 = vector.shape_cast %26 : vector<1x1x8x16xf32> to vector<8x16xf32>
    %28 = arith.subf %27, %23 : vector<8x16xf32>
    %29 = math.exp %28 : vector<8x16xf32>
    %30 = arith.addf %24, %29 : vector<8x16xf32>
    %c0_i32_20 = arith.constant 0 : i32
    %31 = vector.broadcast %c0_i32_20 : i32 to vector<8x16xi32>
    %32 = arith.cmpi eq, %12, %31 : vector<8x16xi32>
    %33 = arith.select %32, %27, %25 : vector<8x16xi1>, vector<8x16xf32>
    %c0_21 = arith.constant 0 : index
    %c1_22 = arith.constant 1 : index
    %c0_23 = arith.constant 0 : index
    %c0_24 = arith.constant 0 : index
    %34 = vector.load %arg2[%c0_21, %c1_22, %c0_23, %c0_24] : memref<1x4x8x16xf32, #tpu.memory_space<vmem>>, vector<1x1x8x16xf32>
    %35 = vector.shape_cast %34 : vector<1x1x8x16xf32> to vector<8x16xf32>
    %36 = arith.subf %35, %23 : vector<8x16xf32>
    %37 = math.exp %36 : vector<8x16xf32>
    %38 = arith.addf %30, %37 : vector<8x16xf32>
    %c1_i32 = arith.constant 1 : i32
    %39 = vector.broadcast %c1_i32 : i32 to vector<8x16xi32>
    %40 = arith.cmpi eq, %12, %39 : vector<8x16xi32>
    %41 = arith.select %40, %35, %33 : vector<8x16xi1>, vector<8x16xf32>
    %c0_25 = arith.constant 0 : index
    %c2_26 = arith.constant 2 : index
    %c0_27 = arith.constant 0 : index
    %c0_28 = arith.constant 0 : index
    %42 = vector.load %arg2[%c0_25, %c2_26, %c0_27, %c0_28] : memref<1x4x8x16xf32, #tpu.memory_space<vmem>>, vector<1x1x8x16xf32>
    %43 = vector.shape_cast %42 : vector<1x1x8x16xf32> to vector<8x16xf32>
    %44 = arith.subf %43, %23 : vector<8x16xf32>
    %45 = math.exp %44 : vector<8x16xf32>
    %46 = arith.addf %38, %45 : vector<8x16xf32>
    %c2_i32 = arith.constant 2 : i32
    %47 = vector.broadcast %c2_i32 : i32 to vector<8x16xi32>
    %48 = arith.cmpi eq, %12, %47 : vector<8x16xi32>
    %49 = arith.select %48, %43, %41 : vector<8x16xi1>, vector<8x16xf32>
    %c0_29 = arith.constant 0 : index
    %c3_30 = arith.constant 3 : index
    %c0_31 = arith.constant 0 : index
    %c0_32 = arith.constant 0 : index
    %50 = vector.load %arg2[%c0_29, %c3_30, %c0_31, %c0_32] : memref<1x4x8x16xf32, #tpu.memory_space<vmem>>, vector<1x1x8x16xf32>
    %51 = vector.shape_cast %50 : vector<1x1x8x16xf32> to vector<8x16xf32>
    %52 = arith.subf %51, %23 : vector<8x16xf32>
    %53 = math.exp %52 : vector<8x16xf32>
    %54 = arith.addf %46, %53 : vector<8x16xf32>
    %c3_i32 = arith.constant 3 : i32
    %55 = vector.broadcast %c3_i32 : i32 to vector<8x16xi32>
    %56 = arith.cmpi eq, %12, %55 : vector<8x16xi32>
    %57 = arith.select %56, %51, %49 : vector<8x16xi1>, vector<8x16xf32>
    %58 = math.log %54 : vector<8x16xf32>
    %59 = arith.addf %23, %58 : vector<8x16xf32>
    %60 = arith.subf %59, %57 : vector<8x16xf32>
    %cst_33 = arith.constant 0.000000e+00 : f32
    %61 = vector.broadcast %cst_33 : f32 to vector<8x16xf32>
    %62 = arith.maximumf %60, %61 : vector<8x16xf32>
    %cst_34 = arith.constant -1.000000e+00 : f32
    %63 = vector.broadcast %cst_34 : f32 to vector<8x16xf32>
    %64 = arith.select %10, %62, %63 : vector<8x16xi1>, vector<8x16xf32>
    %c0_35 = arith.constant 0 : index
    %c0_36 = arith.constant 0 : index
    %c0_37 = arith.constant 0 : index
    %65 = vector.load %arg4[%c0_35, %c0_36, %c0_37] : memref<1x8x16xf32, #tpu.memory_space<vmem>>, vector<1x8x16xf32>
    %66 = vector.shape_cast %65 : vector<1x8x16xf32> to vector<8x16xf32>
    %67 = vector.shape_cast %64 : vector<8x16xf32> to vector<1x8x16xf32>
    tpu.vector_store %arg4[%c0_35, %c0_36, %c0_37], %67 {strides = array<i32>} : memref<1x8x16xf32, #tpu.memory_space<vmem>>, vector<1x8x16xf32>,
    %68 = tpu.iota {dimensions = array<i32: 1>} : vector<1x128xi32>
    %cst_38 = arith.constant 0.000000e+00 : f32
    %69 = vector.broadcast %cst_38 : f32 to vector<1x128xf32>
    %cst_39 = arith.constant 0.000000e+00 : f32
    %70 = vector.broadcast %cst_39 : f32 to vector<8x16xf32>
    %71 = arith.cmpf oge, %64, %70 : vector<8x16xf32>
    %72 = arith.extui %71 : vector<8x16xi1> to vector<8x16xi32>
    %73 = arith.sitofp %72 : vector<8x16xi32> to vector<8x16xf32>
    %74 = vector.shape_cast %73 : vector<8x16xf32> to vector<1x8x16xf32>
    %cst_40 = arith.constant dense<0.000000e+00> : vector<1xf32>
    %75 = vector.multi_reduction <add>, %74, %cst_40 [1, 2] : vector<1x8x16xf32> to vector<1xf32>
    %76 = vector.shape_cast %75 : vector<1xf32> to vector<1x1x1xf32>
    %77 = vector.extract %76[0, 0, 0] : f32 from vector<1x1x1xf32>
    %c0_i32_41 = arith.constant 0 : i32
    %78 = vector.broadcast %c0_i32_41 : i32 to vector<1x128xi32>
    %79 = arith.cmpi eq, %68, %78 : vector<1x128xi32>
    %cst_42 = arith.constant 0.000000e+00 : f32
    %80 = vector.broadcast %77 : f32 to vector<1x128xf32>
    %81 = vector.broadcast %cst_42 : f32 to vector<1x128xf32>
    %82 = arith.select %79, %80, %81 : vector<1x128xi1>, vector<1x128xf32>
    %83 = arith.addf %69, %82 : vector<1x128xf32>
    %cst_43 = arith.constant 0.0111460919 : f32
    %84 = vector.broadcast %cst_43 : f32 to vector<8x16xf32>
    %85 = arith.cmpf oge, %64, %84 : vector<8x16xf32>
    %86 = arith.extui %85 : vector<8x16xi1> to vector<8x16xi32>
    %87 = arith.sitofp %86 : vector<8x16xi32> to vector<8x16xf32>
    %88 = vector.shape_cast %87 : vector<8x16xf32> to vector<1x8x16xf32>
    %cst_44 = arith.constant dense<0.000000e+00> : vector<1xf32>
    %89 = vector.multi_reduction <add>, %88, %cst_44 [1, 2] : vector<1x8x16xf32> to vector<1xf32>
    %90 = vector.shape_cast %89 : vector<1xf32> to vector<1x1x1xf32>
    %91 = vector.extract %90[0, 0, 0] : f32 from vector<1x1x1xf32>
    %c1_i32_45 = arith.constant 1 : i32
    %92 = vector.broadcast %c1_i32_45 : i32 to vector<1x128xi32>
    %93 = arith.cmpi eq, %68, %92 : vector<1x128xi32>
    %cst_46 = arith.constant 0.000000e+00 : f32
    %94 = vector.broadcast %91 : f32 to vector<1x128xf32>
    %95 = vector.broadcast %cst_46 : f32 to vector<1x128xf32>
    %96 = arith.select %93, %94, %95 : vector<1x128xi1>, vector<1x128xf32>
    %97 = arith.addf %83, %96 : vector<1x128xf32>
    %cst_47 = arith.constant 0.0222921837 : f32
    %98 = vector.broadcast %cst_47 : f32 to vector<8x16xf32>
    %99 = arith.cmpf oge, %64, %98 : vector<8x16xf32>
    %100 = arith.extui %99 : vector<8x16xi1> to vector<8x16xi32>
    %101 = arith.sitofp %100 : vector<8x16xi32> to vector<8x16xf32>
    %102 = vector.shape_cast %101 : vector<8x16xf32> to vector<1x8x16xf32>
    %cst_48 = arith.constant dense<0.000000e+00> : vector<1xf32>
    %103 = vector.multi_reduction <add>, %102, %cst_48 [1, 2] : vector<1x8x16xf32> to vector<1xf32>
    %104 = vector.shape_cast %103 : vector<1xf32> to vector<1x1x1xf32>
    %105 = vector.extract %104[0, 0, 0] : f32 from vector<1x1x1xf32>
    %c2_i32_49 = arith.constant 2 : i32
    %106 = vector.broadcast %c2_i32_49 : i32 to vector<1x128xi32>
    %107 = arith.cmpi eq, %68, %106 : vector<1x128xi32>
    %cst_50 = arith.constant 0.000000e+00 : f32
    %108 = vector.broadcast %105 : f32 to vector<1x128xf32>
    %109 = vector.broadcast %cst_50 : f32 to vector<1x128xf32>
    %110 = arith.select %107, %108, %109 : vector<1x128xi1>, vector<1x128xf32>
    %111 = arith.addf %97, %110 : vector<1x128xf32>
    %cst_51 = arith.constant 0.0334382765 : f32
    %112 = vector.broadcast %cst_51 : f32 to vector<8x16xf32>
    %113 = arith.cmpf oge, %64, %112 : vector<8x16xf32>
    %114 = arith.extui %113 : vector<8x16xi1> to vector<8x16xi32>
    %115 = arith.sitofp %114 : vector<8x16xi32> to vector<8x16xf32>
    %116 = vector.shape_cast %115 : vector<8x16xf32> to vector<1x8x16xf32>
    %cst_52 = arith.constant dense<0.000000e+00> : vector<1xf32>
    %117 = vector.multi_reduction <add>, %116, %cst_52 [1, 2] : vector<1x8x16xf32> to vector<1xf32>
    %118 = vector.shape_cast %117 : vector<1xf32> to vector<1x1x1xf32>
    %119 = vector.extract %118[0, 0, 0] : f32 from vector<1x1x1xf32>
    %c3_i32_53 = arith.constant 3 : i32
    %120 = vector.broadcast %c3_i32_53 : i32 to vector<1x128xi32>
    %121 = arith.cmpi eq, %68, %120 : vector<1x128xi32>
    %cst_54 = arith.constant 0.000000e+00 : f32
    %122 = vector.broadcast %119 : f32 to vector<1x128xf32>
    %123 = vector.broadcast %cst_54 : f32 to vector<1x128xf32>
    %124 = arith.select %121, %122, %123 : vector<1x128xi1>, vector<1x128xf32>
    %125 = arith.addf %111, %124 : vector<1x128xf32>
    %cst_55 = arith.constant 0.0445843674 : f32
    %126 = vector.broadcast %cst_55 : f32 to vector<8x16xf32>
    %127 = arith.cmpf oge, %64, %126 : vector<8x16xf32>
    %128 = arith.extui %127 : vector<8x16xi1> to vector<8x16xi32>
    %129 = arith.sitofp %128 : vector<8x16xi32> to vector<8x16xf32>
    %130 = vector.shape_cast %129 : vector<8x16xf32> to vector<1x8x16xf32>
    %cst_56 = arith.constant dense<0.000000e+00> : vector<1xf32>
    %131 = vector.multi_reduction <add>, %130, %cst_56 [1, 2] : vector<1x8x16xf32> to vector<1xf32>
    %132 = vector.shape_cast %131 : vector<1xf32> to vector<1x1x1xf32>
    %133 = vector.extract %132[0, 0, 0] : f32 from vector<1x1x1xf32>
    %c4_i32 = arith.constant 4 : i32
    %134 = vector.broadcast %c4_i32 : i32 to vector<1x128xi32>
    %135 = arith.cmpi eq, %68, %134 : vector<1x128xi32>
    %cst_57 = arith.constant 0.000000e+00 : f32
    %136 = vector.broadcast %133 : f32 to vector<1x128xf32>
    %137 = vector.broadcast %cst_57 : f32 to vector<1x128xf32>
    %138 = arith.select %135, %136, %137 : vector<1x128xi1>, vector<1x128xf32>
    %139 = arith.addf %125, %138 : vector<1x128xf32>
    %cst_58 = arith.constant 0.0557304583 : f32
    %140 = vector.broadcast %cst_58 : f32 to vector<8x16xf32>
    %141 = arith.cmpf oge, %64, %140 : vector<8x16xf32>
    %142 = arith.extui %141 : vector<8x16xi1> to vector<8x16xi32>
    %143 = arith.sitofp %142 : vector<8x16xi32> to vector<8x16xf32>
    %144 = vector.shape_cast %143 : vector<8x16xf32> to vector<1x8x16xf32>
    %cst_59 = arith.constant dense<0.000000e+00> : vector<1xf32>
    %145 = vector.multi_reduction <add>, %144, %cst_59 [1, 2] : vector<1x8x16xf32> to vector<1xf32>
    %146 = vector.shape_cast %145 : vector<1xf32> to vector<1x1x1xf32>
    %147 = vector.extract %146[0, 0, 0] : f32 from vector<1x1x1xf32>
    %c5_i32 = arith.constant 5 : i32
    %148 = vector.broadcast %c5_i32 : i32 to vector<1x128xi32>
    %149 = arith.cmpi eq, %68, %148 : vector<1x128xi32>
    %cst_60 = arith.constant 0.000000e+00 : f32
    %150 = vector.broadcast %147 : f32 to vector<1x128xf32>
    %151 = vector.broadcast %cst_60 : f32 to vector<1x128xf32>
    %152 = arith.select %149, %150, %151 : vector<1x128xi1>, vector<1x128xf32>
    %153 = arith.addf %139, %152 : vector<1x128xf32>
    %cst_61 = arith.constant 0.066876553 : f32
    %154 = vector.broadcast %cst_61 : f32 to vector<8x16xf32>
    %155 = arith.cmpf oge, %64, %154 : vector<8x16xf32>
    %156 = arith.extui %155 : vector<8x16xi1> to vector<8x16xi32>
    %157 = arith.sitofp %156 : vector<8x16xi32> to vector<8x16xf32>
    %158 = vector.shape_cast %157 : vector<8x16xf32> to vector<1x8x16xf32>
    %cst_62 = arith.constant dense<0.000000e+00> : vector<1xf32>
    %159 = vector.multi_reduction <add>, %158, %cst_62 [1, 2] : vector<1x8x16xf32> to vector<1xf32>
    %160 = vector.shape_cast %159 : vector<1xf32> to vector<1x1x1xf32>
    %161 = vector.extract %160[0, 0, 0] : f32 from vector<1x1x1xf32>
    %c6_i32 = arith.constant 6 : i32
    %162 = vector.broadcast %c6_i32 : i32 to vector<1x128xi32>
    %163 = arith.cmpi eq, %68, %162 : vector<1x128xi32>
    %cst_63 = arith.constant 0.000000e+00 : f32
    %164 = vector.broadcast %161 : f32 to vector<1x128xf32>
    %165 = vector.broadcast %cst_63 : f32 to vector<1x128xf32>
    %166 = arith.select %163, %164, %165 : vector<1x128xi1>, vector<1x128xf32>
    %167 = arith.addf %153, %166 : vector<1x128xf32>
    %cst_64 = arith.constant 0.0780226439 : f32
    %168 = vector.broadcast %cst_64 : f32 to vector<8x16xf32>
    %169 = arith.cmpf oge, %64, %168 : vector<8x16xf32>
    %170 = arith.extui %169 : vector<8x16xi1> to vector<8x16xi32>
    %171 = arith.sitofp %170 : vector<8x16xi32> to vector<8x16xf32>
    %172 = vector.shape_cast %171 : vector<8x16xf32> to vector<1x8x16xf32>
    %cst_65 = arith.constant dense<0.000000e+00> : vector<1xf32>
    %173 = vector.multi_reduction <add>, %172, %cst_65 [1, 2] : vector<1x8x16xf32> to vector<1xf32>
    %174 = vector.shape_cast %173 : vector<1xf32> to vector<1x1x1xf32>
    %175 = vector.extract %174[0, 0, 0] : f32 from vector<1x1x1xf32>
    %c7_i32 = arith.constant 7 : i32
    %176 = vector.broadcast %c7_i32 : i32 to vector<1x128xi32>
    %177 = arith.cmpi eq, %68, %176 : vector<1x128xi32>
    %cst_66 = arith.constant 0.000000e+00 : f32
    %178 = vector.broadcast %175 : f32 to vector<1x128xf32>
    %179 = vector.broadcast %cst_66 : f32 to vector<1x128xf32>
    %180 = arith.select %177, %178, %179 : vector<1x128xi1>, vector<1x128xf32>
    %181 = arith.addf %167, %180 : vector<1x128xf32>
    %cst_67 = arith.constant 0.0891687348 : f32
    %182 = vector.broadcast %cst_67 : f32 to vector<8x16xf32>
    %183 = arith.cmpf oge, %64, %182 : vector<8x16xf32>
    %184 = arith.extui %183 : vector<8x16xi1> to vector<8x16xi32>
    %185 = arith.sitofp %184 : vector<8x16xi32> to vector<8x16xf32>
    %186 = vector.shape_cast %185 : vector<8x16xf32> to vector<1x8x16xf32>
    %cst_68 = arith.constant dense<0.000000e+00> : vector<1xf32>
    %187 = vector.multi_reduction <add>, %186, %cst_68 [1, 2] : vector<1x8x16xf32> to vector<1xf32>
    %188 = vector.shape_cast %187 : vector<1xf32> to vector<1x1x1xf32>
    %189 = vector.extract %188[0, 0, 0] : f32 from vector<1x1x1xf32>
    %c8_i32_69 = arith.constant 8 : i32
    %190 = vector.broadcast %c8_i32_69 : i32 to vector<1x128xi32>
    %191 = arith.cmpi eq, %68, %190 : vector<1x128xi32>
    %cst_70 = arith.constant 0.000000e+00 : f32
    %192 = vector.broadcast %189 : f32 to vector<1x128xf32>
    %193 = vector.broadcast %cst_70 : f32 to vector<1x128xf32>
    %194 = arith.select %191, %192, %193 : vector<1x128xi1>, vector<1x128xf32>
    %195 = arith.addf %181, %194 : vector<1x128xf32>
    %cst_71 = arith.constant 0.100314826 : f32
    %196 = vector.broadcast %cst_71 : f32 to vector<8x16xf32>
    %197 = arith.cmpf oge, %64, %196 : vector<8x16xf32>
    %198 = arith.extui %197 : vector<8x16xi1> to vector<8x16xi32>
    %199 = arith.sitofp %198 : vector<8x16xi32> to vector<8x16xf32>
    %200 = vector.shape_cast %199 : vector<8x16xf32> to vector<1x8x16xf32>
    %cst_72 = arith.constant dense<0.000000e+00> : vector<1xf32>
    %201 = vector.multi_reduction <add>, %200, %cst_72 [1, 2] : vector<1x8x16xf32> to vector<1xf32>
    %202 = vector.shape_cast %201 : vector<1xf32> to vector<1x1x1xf32>
    %203 = vector.extract %202[0, 0, 0] : f32 from vector<1x1x1xf32>
    %c9_i32 = arith.constant 9 : i32
    %204 = vector.broadcast %c9_i32 : i32 to vector<1x128xi32>
    %205 = arith.cmpi eq, %68, %204 : vector<1x128xi32>
    %cst_73 = arith.constant 0.000000e+00 : f32
    %206 = vector.broadcast %203 : f32 to vector<1x128xf32>
    %207 = vector.broadcast %cst_73 : f32 to vector<1x128xf32>
    %208 = arith.select %205, %206, %207 : vector<1x128xi1>, vector<1x128xf32>
    %209 = arith.addf %195, %208 : vector<1x128xf32>
    %cst_74 = arith.constant 0.111460917 : f32
    %210 = vector.broadcast %cst_74 : f32 to vector<8x16xf32>
    %211 = arith.cmpf oge, %64, %210 : vector<8x16xf32>
    %212 = arith.extui %211 : vector<8x16xi1> to vector<8x16xi32>
    %213 = arith.sitofp %212 : vector<8x16xi32> to vector<8x16xf32>
    %214 = vector.shape_cast %213 : vector<8x16xf32> to vector<1x8x16xf32>
    %cst_75 = arith.constant dense<0.000000e+00> : vector<1xf32>
    %215 = vector.multi_reduction <add>, %214, %cst_75 [1, 2] : vector<1x8x16xf32> to vector<1xf32>
    %216 = vector.shape_cast %215 : vector<1xf32> to vector<1x1x1xf32>
    %217 = vector.extract %216[0, 0, 0] : f32 from vector<1x1x1xf32>
    %c10_i32 = arith.constant 10 : i32
    %218 = vector.broadcast %c10_i32 : i32 to vector<1x128xi32>
    %219 = arith.cmpi eq, %68, %218 : vector<1x128xi32>
    %cst_76 = arith.constant 0.000000e+00 : f32
    %220 = vector.broadcast %217 : f32 to vector<1x128xf32>
    %221 = vector.broadcast %cst_76 : f32 to vector<1x128xf32>
    %222 = arith.select %219, %220, %221 : vector<1x128xi1>, vector<1x128xf32>
    %223 = arith.addf %209, %222 : vector<1x128xf32>
    %cst_77 = arith.constant 0.122607015 : f32
    %224 = vector.broadcast %cst_77 : f32 to vector<8x16xf32>
    %225 = arith.cmpf oge, %64, %224 : vector<8x16xf32>
    %226 = arith.extui %225 : vector<8x16xi1> to vector<8x16xi32>
    %227 = arith.sitofp %226 : vector<8x16xi32> to vector<8x16xf32>
    %228 = vector.shape_cast %227 : vector<8x16xf32> to vector<1x8x16xf32>
    %cst_78 = arith.constant dense<0.000000e+00> : vector<1xf32>
    %229 = vector.multi_reduction <add>, %228, %cst_78 [1, 2] : vector<1x8x16xf32> to vector<1xf32>
    %230 = vector.shape_cast %229 : vector<1xf32> to vector<1x1x1xf32>
    %231 = vector.extract %230[0, 0, 0] : f32 from vector<1x1x1xf32>
    %c11_i32 = arith.constant 11 : i32
    %232 = vector.broadcast %c11_i32 : i32 to vector<1x128xi32>
    %233 = arith.cmpi eq, %68, %232 : vector<1x128xi32>
    %cst_79 = arith.constant 0.000000e+00 : f32
    %234 = vector.broadcast %231 : f32 to vector<1x128xf32>
    %235 = vector.broadcast %cst_79 : f32 to vector<1x128xf32>
    %236 = arith.select %233, %234, %235 : vector<1x128xi1>, vector<1x128xf32>
    %237 = arith.addf %223, %236 : vector<1x128xf32>
    %cst_80 = arith.constant 0.133753106 : f32
    %238 = vector.broadcast %cst_80 : f32 to vector<8x16xf32>
    %239 = arith.cmpf oge, %64, %238 : vector<8x16xf32>
    %240 = arith.extui %239 : vector<8x16xi1> to vector<8x16xi32>
    %241 = arith.sitofp %240 : vector<8x16xi32> to vector<8x16xf32>
    %242 = vector.shape_cast %241 : vector<8x16xf32> to vector<1x8x16xf32>
    %cst_81 = arith.constant dense<0.000000e+00> : vector<1xf32>
    %243 = vector.multi_reduction <add>, %242, %cst_81 [1, 2] : vector<1x8x16xf32> to vector<1xf32>
    %244 = vector.shape_cast %243 : vector<1xf32> to vector<1x1x1xf32>
    %245 = vector.extract %244[0, 0, 0] : f32 from vector<1x1x1xf32>
    %c12_i32 = arith.constant 12 : i32
    %246 = vector.broadcast %c12_i32 : i32 to vector<1x128xi32>
    %247 = arith.cmpi eq, %68, %246 : vector<1x128xi32>
    %cst_82 = arith.constant 0.000000e+00 : f32
    %248 = vector.broadcast %245 : f32 to vector<1x128xf32>
    %249 = vector.broadcast %cst_82 : f32 to vector<1x128xf32>
    %250 = arith.select %247, %248, %249 : vector<1x128xi1>, vector<1x128xf32>
    %251 = arith.addf %237, %250 : vector<1x128xf32>
    %cst_83 = arith.constant 0.144899189 : f32
    %252 = vector.broadcast %cst_83 : f32 to vector<8x16xf32>
    %253 = arith.cmpf oge, %64, %252 : vector<8x16xf32>
    %254 = arith.extui %253 : vector<8x16xi1> to vector<8x16xi32>
    %255 = arith.sitofp %254 : vector<8x16xi32> to vector<8x16xf32>
    %256 = vector.shape_cast %255 : vector<8x16xf32> to vector<1x8x16xf32>
    %cst_84 = arith.constant dense<0.000000e+00> : vector<1xf32>
    %257 = vector.multi_reduction <add>, %256, %cst_84 [1, 2] : vector<1x8x16xf32> to vector<1xf32>
    %258 = vector.shape_cast %257 : vector<1xf32> to vector<1x1x1xf32>
    %259 = vector.extract %258[0, 0, 0] : f32 from vector<1x1x1xf32>
    %c13_i32 = arith.constant 13 : i32
    %260 = vector.broadcast %c13_i32 : i32 to vector<1x128xi32>
    %261 = arith.cmpi eq, %68, %260 : vector<1x128xi32>
    %cst_85 = arith.constant 0.000000e+00 : f32
    %262 = vector.broadcast %259 : f32 to vector<1x128xf32>
    %263 = vector.broadcast %cst_85 : f32 to vector<1x128xf32>
    %264 = arith.select %261, %262, %263 : vector<1x128xi1>, vector<1x128xf32>
    %265 = arith.addf %251, %264 : vector<1x128xf32>
    %cst_86 = arith.constant 0.156045288 : f32
    %266 = vector.broadcast %cst_86 : f32 to vector<8x16xf32>
    %267 = arith.cmpf oge, %64, %266 : vector<8x16xf32>
    %268 = arith.extui %267 : vector<8x16xi1> to vector<8x16xi32>
    %269 = arith.sitofp %268 : vector<8x16xi32> to vector<8x16xf32>
    %270 = vector.shape_cast %269 : vector<8x16xf32> to vector<1x8x16xf32>
    %cst_87 = arith.constant dense<0.000000e+00> : vector<1xf32>
    %271 = vector.multi_reduction <add>, %270, %cst_87 [1, 2] : vector<1x8x16xf32> to vector<1xf32>
    %272 = vector.shape_cast %271 : vector<1xf32> to vector<1x1x1xf32>
    %273 = vector.extract %272[0, 0, 0] : f32 from vector<1x1x1xf32>
    %c14_i32 = arith.constant 14 : i32
    %274 = vector.broadcast %c14_i32 : i32 to vector<1x128xi32>
    %275 = arith.cmpi eq, %68, %274 : vector<1x128xi32>
    %cst_88 = arith.constant 0.000000e+00 : f32
    %276 = vector.broadcast %273 : f32 to vector<1x128xf32>
    %277 = vector.broadcast %cst_88 : f32 to vector<1x128xf32>
    %278 = arith.select %275, %276, %277 : vector<1x128xi1>, vector<1x128xf32>
    %279 = arith.addf %265, %278 : vector<1x128xf32>
    %cst_89 = arith.constant 0.167191386 : f32
    %280 = vector.broadcast %cst_89 : f32 to vector<8x16xf32>
    %281 = arith.cmpf oge, %64, %280 : vector<8x16xf32>
    %282 = arith.extui %281 : vector<8x16xi1> to vector<8x16xi32>
    %283 = arith.sitofp %282 : vector<8x16xi32> to vector<8x16xf32>
    %284 = vector.shape_cast %283 : vector<8x16xf32> to vector<1x8x16xf32>
    %cst_90 = arith.constant dense<0.000000e+00> : vector<1xf32>
    %285 = vector.multi_reduction <add>, %284, %cst_90 [1, 2] : vector<1x8x16xf32> to vector<1xf32>
    %286 = vector.shape_cast %285 : vector<1xf32> to vector<1x1x1xf32>
    %287 = vector.extract %286[0, 0, 0] : f32 from vector<1x1x1xf32>
    %c15_i32 = arith.constant 15 : i32
    %288 = vector.broadcast %c15_i32 : i32 to vector<1x128xi32>
    %289 = arith.cmpi eq, %68, %288 : vector<1x128xi32>
    %cst_91 = arith.constant 0.000000e+00 : f32
    %290 = vector.broadcast %287 : f32 to vector<1x128xf32>
    %291 = vector.broadcast %cst_91 : f32 to vector<1x128xf32>
    %292 = arith.select %289, %290, %291 : vector<1x128xi1>, vector<1x128xf32>
    %293 = arith.addf %279, %292 : vector<1x128xf32>
    %cst_92 = arith.constant 0.17833747 : f32
    %294 = vector.broadcast %cst_92 : f32 to vector<8x16xf32>
    %295 = arith.cmpf oge, %64, %294 : vector<8x16xf32>
    %296 = arith.extui %295 : vector<8x16xi1> to vector<8x16xi32>
    %297 = arith.sitofp %296 : vector<8x16xi32> to vector<8x16xf32>
    %298 = vector.shape_cast %297 : vector<8x16xf32> to vector<1x8x16xf32>
    %cst_93 = arith.constant dense<0.000000e+00> : vector<1xf32>
    %299 = vector.multi_reduction <add>, %298, %cst_93 [1, 2] : vector<1x8x16xf32> to vector<1xf32>
    %300 = vector.shape_cast %299 : vector<1xf32> to vector<1x1x1xf32>
    %301 = vector.extract %300[0, 0, 0] : f32 from vector<1x1x1xf32>
    %c16_i32_94 = arith.constant 16 : i32
    %302 = vector.broadcast %c16_i32_94 : i32 to vector<1x128xi32>
    %303 = arith.cmpi eq, %68, %302 : vector<1x128xi32>
    %cst_95 = arith.constant 0.000000e+00 : f32
    %304 = vector.broadcast %301 : f32 to vector<1x128xf32>
    %305 = vector.broadcast %cst_95 : f32 to vector<1x128xf32>
    %306 = arith.select %303, %304, %305 : vector<1x128xi1>, vector<1x128xf32>
    %307 = arith.addf %293, %306 : vector<1x128xf32>
    %cst_96 = arith.constant 0.189483568 : f32
    %308 = vector.broadcast %cst_96 : f32 to vector<8x16xf32>
    %309 = arith.cmpf oge, %64, %308 : vector<8x16xf32>
    %310 = arith.extui %309 : vector<8x16xi1> to vector<8x16xi32>
    %311 = arith.sitofp %310 : vector<8x16xi32> to vector<8x16xf32>
    %312 = vector.shape_cast %311 : vector<8x16xf32> to vector<1x8x16xf32>
    %cst_97 = arith.constant dense<0.000000e+00> : vector<1xf32>
    %313 = vector.multi_reduction <add>, %312, %cst_97 [1, 2] : vector<1x8x16xf32> to vector<1xf32>
    %314 = vector.shape_cast %313 : vector<1xf32> to vector<1x1x1xf32>
    %315 = vector.extract %314[0, 0, 0] : f32 from vector<1x1x1xf32>
    %c17_i32 = arith.constant 17 : i32
    %316 = vector.broadcast %c17_i32 : i32 to vector<1x128xi32>
    %317 = arith.cmpi eq, %68, %316 : vector<1x128xi32>
    %cst_98 = arith.constant 0.000000e+00 : f32
    %318 = vector.broadcast %315 : f32 to vector<1x128xf32>
    %319 = vector.broadcast %cst_98 : f32 to vector<1x128xf32>
    %320 = arith.select %317, %318, %319 : vector<1x128xi1>, vector<1x128xf32>
    %321 = arith.addf %307, %320 : vector<1x128xf32>
    %cst_99 = arith.constant 0.200629652 : f32
    %322 = vector.broadcast %cst_99 : f32 to vector<8x16xf32>
    %323 = arith.cmpf oge, %64, %322 : vector<8x16xf32>
    %324 = arith.extui %323 : vector<8x16xi1> to vector<8x16xi32>
    %325 = arith.sitofp %324 : vector<8x16xi32> to vector<8x16xf32>
    %326 = vector.shape_cast %325 : vector<8x16xf32> to vector<1x8x16xf32>
    %cst_100 = arith.constant dense<0.000000e+00> : vector<1xf32>
    %327 = vector.multi_reduction <add>, %326, %cst_100 [1, 2] : vector<1x8x16xf32> to vector<1xf32>
    %328 = vector.shape_cast %327 : vector<1xf32> to vector<1x1x1xf32>
    %329 = vector.extract %328[0, 0, 0] : f32 from vector<1x1x1xf32>
    %c18_i32 = arith.constant 18 : i32
    %330 = vector.broadcast %c18_i32 : i32 to vector<1x128xi32>
    %331 = arith.cmpi eq, %68, %330 : vector<1x128xi32>
    %cst_101 = arith.constant 0.000000e+00 : f32
    %332 = vector.broadcast %329 : f32 to vector<1x128xf32>
    %333 = vector.broadcast %cst_101 : f32 to vector<1x128xf32>
    %334 = arith.select %331, %332, %333 : vector<1x128xi1>, vector<1x128xf32>
    %335 = arith.addf %321, %334 : vector<1x128xf32>
    %cst_102 = arith.constant 0.21177575 : f32
    %336 = vector.broadcast %cst_102 : f32 to vector<8x16xf32>
    %337 = arith.cmpf oge, %64, %336 : vector<8x16xf32>
    %338 = arith.extui %337 : vector<8x16xi1> to vector<8x16xi32>
    %339 = arith.sitofp %338 : vector<8x16xi32> to vector<8x16xf32>
    %340 = vector.shape_cast %339 : vector<8x16xf32> to vector<1x8x16xf32>
    %cst_103 = arith.constant dense<0.000000e+00> : vector<1xf32>
    %341 = vector.multi_reduction <add>, %340, %cst_103 [1, 2] : vector<1x8x16xf32> to vector<1xf32>
    %342 = vector.shape_cast %341 : vector<1xf32> to vector<1x1x1xf32>
    %343 = vector.extract %342[0, 0, 0] : f32 from vector<1x1x1xf32>
    %c19_i32 = arith.constant 19 : i32
    %344 = vector.broadcast %c19_i32 : i32 to vector<1x128xi32>
    %345 = arith.cmpi eq, %68, %344 : vector<1x128xi32>
    %cst_104 = arith.constant 0.000000e+00 : f32
    %346 = vector.broadcast %343 : f32 to vector<1x128xf32>
    %347 = vector.broadcast %cst_104 : f32 to vector<1x128xf32>
    %348 = arith.select %345, %346, %347 : vector<1x128xi1>, vector<1x128xf32>
    %349 = arith.addf %335, %348 : vector<1x128xf32>
    %cst_105 = arith.constant 0.222921833 : f32
    %350 = vector.broadcast %cst_105 : f32 to vector<8x16xf32>
    %351 = arith.cmpf oge, %64, %350 : vector<8x16xf32>
    %352 = arith.extui %351 : vector<8x16xi1> to vector<8x16xi32>
    %353 = arith.sitofp %352 : vector<8x16xi32> to vector<8x16xf32>
    %354 = vector.shape_cast %353 : vector<8x16xf32> to vector<1x8x16xf32>
    %cst_106 = arith.constant dense<0.000000e+00> : vector<1xf32>
    %355 = vector.multi_reduction <add>, %354, %cst_106 [1, 2] : vector<1x8x16xf32> to vector<1xf32>
    %356 = vector.shape_cast %355 : vector<1xf32> to vector<1x1x1xf32>
    %357 = vector.extract %356[0, 0, 0] : f32 from vector<1x1x1xf32>
    %c20_i32 = arith.constant 20 : i32
    %358 = vector.broadcast %c20_i32 : i32 to vector<1x128xi32>
    %359 = arith.cmpi eq, %68, %358 : vector<1x128xi32>
    %cst_107 = arith.constant 0.000000e+00 : f32
    %360 = vector.broadcast %357 : f32 to vector<1x128xf32>
    %361 = vector.broadcast %cst_107 : f32 to vector<1x128xf32>
    %362 = arith.select %359, %360, %361 : vector<1x128xi1>, vector<1x128xf32>
    %363 = arith.addf %349, %362 : vector<1x128xf32>
    %cst_108 = arith.constant 0.234067932 : f32
    %364 = vector.broadcast %cst_108 : f32 to vector<8x16xf32>
    %365 = arith.cmpf oge, %64, %364 : vector<8x16xf32>
    %366 = arith.extui %365 : vector<8x16xi1> to vector<8x16xi32>
    %367 = arith.sitofp %366 : vector<8x16xi32> to vector<8x16xf32>
    %368 = vector.shape_cast %367 : vector<8x16xf32> to vector<1x8x16xf32>
    %cst_109 = arith.constant dense<0.000000e+00> : vector<1xf32>
    %369 = vector.multi_reduction <add>, %368, %cst_109 [1, 2] : vector<1x8x16xf32> to vector<1xf32>
    %370 = vector.shape_cast %369 : vector<1xf32> to vector<1x1x1xf32>
    %371 = vector.extract %370[0, 0, 0] : f32 from vector<1x1x1xf32>
    %c21_i32 = arith.constant 21 : i32
    %372 = vector.broadcast %c21_i32 : i32 to vector<1x128xi32>
    %373 = arith.cmpi eq, %68, %372 : vector<1x128xi32>
    %cst_110 = arith.constant 0.000000e+00 : f32
    %374 = vector.broadcast %371 : f32 to vector<1x128xf32>
    %375 = vector.broadcast %cst_110 : f32 to vector<1x128xf32>
    %376 = arith.select %373, %374, %375 : vector<1x128xi1>, vector<1x128xf32>
    %377 = arith.addf %363, %376 : vector<1x128xf32>
    %cst_111 = arith.constant 0.24521403 : f32
    %378 = vector.broadcast %cst_111 : f32 to vector<8x16xf32>
    %379 = arith.cmpf oge, %64, %378 : vector<8x16xf32>
    %380 = arith.extui %379 : vector<8x16xi1> to vector<8x16xi32>
    %381 = arith.sitofp %380 : vector<8x16xi32> to vector<8x16xf32>
    %382 = vector.shape_cast %381 : vector<8x16xf32> to vector<1x8x16xf32>
    %cst_112 = arith.constant dense<0.000000e+00> : vector<1xf32>
    %383 = vector.multi_reduction <add>, %382, %cst_112 [1, 2] : vector<1x8x16xf32> to vector<1xf32>
    %384 = vector.shape_cast %383 : vector<1xf32> to vector<1x1x1xf32>
    %385 = vector.extract %384[0, 0, 0] : f32 from vector<1x1x1xf32>
    %c22_i32 = arith.constant 22 : i32
    %386 = vector.broadcast %c22_i32 : i32 to vector<1x128xi32>
    %387 = arith.cmpi eq, %68, %386 : vector<1x128xi32>
    %cst_113 = arith.constant 0.000000e+00 : f32
    %388 = vector.broadcast %385 : f32 to vector<1x128xf32>
    %389 = vector.broadcast %cst_113 : f32 to vector<1x128xf32>
    %390 = arith.select %387, %388, %389 : vector<1x128xi1>, vector<1x128xf32>
    %391 = arith.addf %377, %390 : vector<1x128xf32>
    %cst_114 = arith.constant 0.256360114 : f32
    %392 = vector.broadcast %cst_114 : f32 to vector<8x16xf32>
    %393 = arith.cmpf oge, %64, %392 : vector<8x16xf32>
    %394 = arith.extui %393 : vector<8x16xi1> to vector<8x16xi32>
    %395 = arith.sitofp %394 : vector<8x16xi32> to vector<8x16xf32>
    %396 = vector.shape_cast %395 : vector<8x16xf32> to vector<1x8x16xf32>
    %cst_115 = arith.constant dense<0.000000e+00> : vector<1xf32>
    %397 = vector.multi_reduction <add>, %396, %cst_115 [1, 2] : vector<1x8x16xf32> to vector<1xf32>
    %398 = vector.shape_cast %397 : vector<1xf32> to vector<1x1x1xf32>
    %399 = vector.extract %398[0, 0, 0] : f32 from vector<1x1x1xf32>
    %c23_i32 = arith.constant 23 : i32
    %400 = vector.broadcast %c23_i32 : i32 to vector<1x128xi32>
    %401 = arith.cmpi eq, %68, %400 : vector<1x128xi32>
    %cst_116 = arith.constant 0.000000e+00 : f32
    %402 = vector.broadcast %399 : f32 to vector<1x128xf32>
    %403 = vector.broadcast %cst_116 : f32 to vector<1x128xf32>
    %404 = arith.select %401, %402, %403 : vector<1x128xi1>, vector<1x128xf32>
    %405 = arith.addf %391, %404 : vector<1x128xf32>
    %cst_117 = arith.constant 0.267506212 : f32
    %406 = vector.broadcast %cst_117 : f32 to vector<8x16xf32>
    %407 = arith.cmpf oge, %64, %406 : vector<8x16xf32>
    %408 = arith.extui %407 : vector<8x16xi1> to vector<8x16xi32>
    %409 = arith.sitofp %408 : vector<8x16xi32> to vector<8x16xf32>
    %410 = vector.shape_cast %409 : vector<8x16xf32> to vector<1x8x16xf32>
    %cst_118 = arith.constant dense<0.000000e+00> : vector<1xf32>
    %411 = vector.multi_reduction <add>, %410, %cst_118 [1, 2] : vector<1x8x16xf32> to vector<1xf32>
    %412 = vector.shape_cast %411 : vector<1xf32> to vector<1x1x1xf32>
    %413 = vector.extract %412[0, 0, 0] : f32 from vector<1x1x1xf32>
    %c24_i32 = arith.constant 24 : i32
    %414 = vector.broadcast %c24_i32 : i32 to vector<1x128xi32>
    %415 = arith.cmpi eq, %68, %414 : vector<1x128xi32>
    %cst_119 = arith.constant 0.000000e+00 : f32
    %416 = vector.broadcast %413 : f32 to vector<1x128xf32>
    %417 = vector.broadcast %cst_119 : f32 to vector<1x128xf32>
    %418 = arith.select %415, %416, %417 : vector<1x128xi1>, vector<1x128xf32>
    %419 = arith.addf %405, %418 : vector<1x128xf32>
    %cst_120 = arith.constant 0.27865231 : f32
    %420 = vector.broadcast %cst_120 : f32 to vector<8x16xf32>
    %421 = arith.cmpf oge, %64, %420 : vector<8x16xf32>
    %422 = arith.extui %421 : vector<8x16xi1> to vector<8x16xi32>
    %423 = arith.sitofp %422 : vector<8x16xi32> to vector<8x16xf32>
    %424 = vector.shape_cast %423 : vector<8x16xf32> to vector<1x8x16xf32>
    %cst_121 = arith.constant dense<0.000000e+00> : vector<1xf32>
    %425 = vector.multi_reduction <add>, %424, %cst_121 [1, 2] : vector<1x8x16xf32> to vector<1xf32>
    %426 = vector.shape_cast %425 : vector<1xf32> to vector<1x1x1xf32>
    %427 = vector.extract %426[0, 0, 0] : f32 from vector<1x1x1xf32>
    %c25_i32 = arith.constant 25 : i32
    %428 = vector.broadcast %c25_i32 : i32 to vector<1x128xi32>
    %429 = arith.cmpi eq, %68, %428 : vector<1x128xi32>
    %cst_122 = arith.constant 0.000000e+00 : f32
    %430 = vector.broadcast %427 : f32 to vector<1x128xf32>
    %431 = vector.broadcast %cst_122 : f32 to vector<1x128xf32>
    %432 = arith.select %429, %430, %431 : vector<1x128xi1>, vector<1x128xf32>
    %433 = arith.addf %419, %432 : vector<1x128xf32>
    %cst_123 = arith.constant 0.289798379 : f32
    %434 = vector.broadcast %cst_123 : f32 to vector<8x16xf32>
    %435 = arith.cmpf oge, %64, %434 : vector<8x16xf32>
    %436 = arith.extui %435 : vector<8x16xi1> to vector<8x16xi32>
    %437 = arith.sitofp %436 : vector<8x16xi32> to vector<8x16xf32>
    %438 = vector.shape_cast %437 : vector<8x16xf32> to vector<1x8x16xf32>
    %cst_124 = arith.constant dense<0.000000e+00> : vector<1xf32>
    %439 = vector.multi_reduction <add>, %438, %cst_124 [1, 2] : vector<1x8x16xf32> to vector<1xf32>
    %440 = vector.shape_cast %439 : vector<1xf32> to vector<1x1x1xf32>
    %441 = vector.extract %440[0, 0, 0] : f32 from vector<1x1x1xf32>
    %c26_i32 = arith.constant 26 : i32
    %442 = vector.broadcast %c26_i32 : i32 to vector<1x128xi32>
    %443 = arith.cmpi eq, %68, %442 : vector<1x128xi32>
    %cst_125 = arith.constant 0.000000e+00 : f32
    %444 = vector.broadcast %441 : f32 to vector<1x128xf32>
    %445 = vector.broadcast %cst_125 : f32 to vector<1x128xf32>
    %446 = arith.select %443, %444, %445 : vector<1x128xi1>, vector<1x128xf32>
    %447 = arith.addf %433, %446 : vector<1x128xf32>
    %cst_126 = arith.constant 0.300944477 : f32
    %448 = vector.broadcast %cst_126 : f32 to vector<8x16xf32>
    %449 = arith.cmpf oge, %64, %448 : vector<8x16xf32>
    %450 = arith.extui %449 : vector<8x16xi1> to vector<8x16xi32>
    %451 = arith.sitofp %450 : vector<8x16xi32> to vector<8x16xf32>
    %452 = vector.shape_cast %451 : vector<8x16xf32> to vector<1x8x16xf32>
    %cst_127 = arith.constant dense<0.000000e+00> : vector<1xf32>
    %453 = vector.multi_reduction <add>, %452, %cst_127 [1, 2] : vector<1x8x16xf32> to vector<1xf32>
    %454 = vector.shape_cast %453 : vector<1xf32> to vector<1x1x1xf32>
    %455 = vector.extract %454[0, 0, 0] : f32 from vector<1x1x1xf32>
    %c27_i32 = arith.constant 27 : i32
    %456 = vector.broadcast %c27_i32 : i32 to vector<1x128xi32>
    %457 = arith.cmpi eq, %68, %456 : vector<1x128xi32>
    %cst_128 = arith.constant 0.000000e+00 : f32
    %458 = vector.broadcast %455 : f32 to vector<1x128xf32>
    %459 = vector.broadcast %cst_128 : f32 to vector<1x128xf32>
    %460 = arith.select %457, %458, %459 : vector<1x128xi1>, vector<1x128xf32>
    %461 = arith.addf %447, %460 : vector<1x128xf32>
    %cst_129 = arith.constant 0.312090576 : f32
    %462 = vector.broadcast %cst_129 : f32 to vector<8x16xf32>
    %463 = arith.cmpf oge, %64, %462 : vector<8x16xf32>
    %464 = arith.extui %463 : vector<8x16xi1> to vector<8x16xi32>
    %465 = arith.sitofp %464 : vector<8x16xi32> to vector<8x16xf32>
    %466 = vector.shape_cast %465 : vector<8x16xf32> to vector<1x8x16xf32>
    %cst_130 = arith.constant dense<0.000000e+00> : vector<1xf32>
    %467 = vector.multi_reduction <add>, %466, %cst_130 [1, 2] : vector<1x8x16xf32> to vector<1xf32>
    %468 = vector.shape_cast %467 : vector<1xf32> to vector<1x1x1xf32>
    %469 = vector.extract %468[0, 0, 0] : f32 from vector<1x1x1xf32>
    %c28_i32 = arith.constant 28 : i32
    %470 = vector.broadcast %c28_i32 : i32 to vector<1x128xi32>
    %471 = arith.cmpi eq, %68, %470 : vector<1x128xi32>
    %cst_131 = arith.constant 0.000000e+00 : f32
    %472 = vector.broadcast %469 : f32 to vector<1x128xf32>
    %473 = vector.broadcast %cst_131 : f32 to vector<1x128xf32>
    %474 = arith.select %471, %472, %473 : vector<1x128xi1>, vector<1x128xf32>
    %475 = arith.addf %461, %474 : vector<1x128xf32>
    %cst_132 = arith.constant 0.323236674 : f32
    %476 = vector.broadcast %cst_132 : f32 to vector<8x16xf32>
    %477 = arith.cmpf oge, %64, %476 : vector<8x16xf32>
    %478 = arith.extui %477 : vector<8x16xi1> to vector<8x16xi32>
    %479 = arith.sitofp %478 : vector<8x16xi32> to vector<8x16xf32>
    %480 = vector.shape_cast %479 : vector<8x16xf32> to vector<1x8x16xf32>
    %cst_133 = arith.constant dense<0.000000e+00> : vector<1xf32>
    %481 = vector.multi_reduction <add>, %480, %cst_133 [1, 2] : vector<1x8x16xf32> to vector<1xf32>
    %482 = vector.shape_cast %481 : vector<1xf32> to vector<1x1x1xf32>
    %483 = vector.extract %482[0, 0, 0] : f32 from vector<1x1x1xf32>
    %c29_i32 = arith.constant 29 : i32
    %484 = vector.broadcast %c29_i32 : i32 to vector<1x128xi32>
    %485 = arith.cmpi eq, %68, %484 : vector<1x128xi32>
    %cst_134 = arith.constant 0.000000e+00 : f32
    %486 = vector.broadcast %483 : f32 to vector<1x128xf32>
    %487 = vector.broadcast %cst_134 : f32 to vector<1x128xf32>
    %488 = arith.select %485, %486, %487 : vector<1x128xi1>, vector<1x128xf32>
    %489 = arith.addf %475, %488 : vector<1x128xf32>
    %cst_135 = arith.constant 0.334382772 : f32
    %490 = vector.broadcast %cst_135 : f32 to vector<8x16xf32>
    %491 = arith.cmpf oge, %64, %490 : vector<8x16xf32>
    %492 = arith.extui %491 : vector<8x16xi1> to vector<8x16xi32>
    %493 = arith.sitofp %492 : vector<8x16xi32> to vector<8x16xf32>
    %494 = vector.shape_cast %493 : vector<8x16xf32> to vector<1x8x16xf32>
    %cst_136 = arith.constant dense<0.000000e+00> : vector<1xf32>
    %495 = vector.multi_reduction <add>, %494, %cst_136 [1, 2] : vector<1x8x16xf32> to vector<1xf32>
    %496 = vector.shape_cast %495 : vector<1xf32> to vector<1x1x1xf32>
    %497 = vector.extract %496[0, 0, 0] : f32 from vector<1x1x1xf32>
    %c30_i32 = arith.constant 30 : i32
    %498 = vector.broadcast %c30_i32 : i32 to vector<1x128xi32>
    %499 = arith.cmpi eq, %68, %498 : vector<1x128xi32>
    %cst_137 = arith.constant 0.000000e+00 : f32
    %500 = vector.broadcast %497 : f32 to vector<1x128xf32>
    %501 = vector.broadcast %cst_137 : f32 to vector<1x128xf32>
    %502 = arith.select %499, %500, %501 : vector<1x128xi1>, vector<1x128xf32>
    %503 = arith.addf %489, %502 : vector<1x128xf32>
    %cst_138 = arith.constant 0.345528841 : f32
    %504 = vector.broadcast %cst_138 : f32 to vector<8x16xf32>
    %505 = arith.cmpf oge, %64, %504 : vector<8x16xf32>
    %506 = arith.extui %505 : vector<8x16xi1> to vector<8x16xi32>
    %507 = arith.sitofp %506 : vector<8x16xi32> to vector<8x16xf32>
    %508 = vector.shape_cast %507 : vector<8x16xf32> to vector<1x8x16xf32>
    %cst_139 = arith.constant dense<0.000000e+00> : vector<1xf32>
    %509 = vector.multi_reduction <add>, %508, %cst_139 [1, 2] : vector<1x8x16xf32> to vector<1xf32>
    %510 = vector.shape_cast %509 : vector<1xf32> to vector<1x1x1xf32>
    %511 = vector.extract %510[0, 0, 0] : f32 from vector<1x1x1xf32>
    %c31_i32 = arith.constant 31 : i32
    %512 = vector.broadcast %c31_i32 : i32 to vector<1x128xi32>
    %513 = arith.cmpi eq, %68, %512 : vector<1x128xi32>
    %cst_140 = arith.constant 0.000000e+00 : f32
    %514 = vector.broadcast %511 : f32 to vector<1x128xf32>
    %515 = vector.broadcast %cst_140 : f32 to vector<1x128xf32>
    %516 = arith.select %513, %514, %515 : vector<1x128xi1>, vector<1x128xf32>
    %517 = arith.addf %503, %516 : vector<1x128xf32>
    %cst_141 = arith.constant 0.356674939 : f32
    %518 = vector.broadcast %cst_141 : f32 to vector<8x16xf32>
    %519 = arith.cmpf oge, %64, %518 : vector<8x16xf32>
    %520 = arith.extui %519 : vector<8x16xi1> to vector<8x16xi32>
    %521 = arith.sitofp %520 : vector<8x16xi32> to vector<8x16xf32>
    %522 = vector.shape_cast %521 : vector<8x16xf32> to vector<1x8x16xf32>
    %cst_142 = arith.constant dense<0.000000e+00> : vector<1xf32>
    %523 = vector.multi_reduction <add>, %522, %cst_142 [1, 2] : vector<1x8x16xf32> to vector<1xf32>
    %524 = vector.shape_cast %523 : vector<1xf32> to vector<1x1x1xf32>
    %525 = vector.extract %524[0, 0, 0] : f32 from vector<1x1x1xf32>
    %c32_i32 = arith.constant 32 : i32
    %526 = vector.broadcast %c32_i32 : i32 to vector<1x128xi32>
    %527 = arith.cmpi eq, %68, %526 : vector<1x128xi32>
    %cst_143 = arith.constant 0.000000e+00 : f32
    %528 = vector.broadcast %525 : f32 to vector<1x128xf32>
    %529 = vector.broadcast %cst_143 : f32 to vector<1x128xf32>
    %530 = arith.select %527, %528, %529 : vector<1x128xi1>, vector<1x128xf32>
    %531 = arith.addf %517, %530 : vector<1x128xf32>
    %c0_144 = arith.constant 0 : index
    %c0_145 = arith.constant 0 : index
    %532 = vector.load %arg5[%c0_144, %c0_145] : memref<1x128xf32, #tpu.memory_space<vmem>>, vector<1x128xf32>
    tpu.vector_store %arg5[%c0_144, %c0_145], %531 {strides = array<i32>} : memref<1x128xf32, #tpu.memory_space<vmem>>, vector<1x128xf32>,
    return
  }
  func.func @transform_0(%arg0: i32, %arg1: i32) -> (i32, i32, i32, i32) {
    %c0_i32 = arith.constant 0 : i32
    %c0_i32_0 = arith.constant 0 : i32
    %c0_i32_1 = arith.constant 0 : i32
    return %arg0, %c0_i32, %arg1, %c0_i32_0 : i32, i32, i32, i32
  }
  func.func @transform_1(%arg0: i32, %arg1: i32) -> (i32, i32, i32) {
    %c0_i32 = arith.constant 0 : i32
    %c0_i32_0 = arith.constant 0 : i32
    return %arg0, %arg1, %c0_i32 : i32, i32, i32
  }
  func.func @transform_2(%arg0: i32, %arg1: i32) -> (i32, i32, i32) {
    %c0_i32 = arith.constant 0 : i32
    %c0_i32_0 = arith.constant 0 : i32
    return %arg0, %arg1, %c0_i32 : i32, i32, i32
  }
  func.func @transform_3(%arg0: i32, %arg1: i32) -> (i32, i32) {
    %c2_i32 = arith.constant 2 : i32
    %0 = arith.muli %arg0, %c2_i32 : i32
    %1 = arith.addi %0, %arg1 : i32
    %c0_i32 = arith.constant 0 : i32
    %c0_i32_0 = arith.constant 0 : i32
    return %c0_i32, %1 : i32, i32
  }
}

module attributes {stable_mosaic.version = 11 : i64} {
  func.func @_ohem_reduce_kernel(%arg0: i32, %arg1: i32, %arg2: memref<1x1xf32, #tpu.memory_space<smem>>, %arg3: memref<1x16x16xf32, #tpu.memory_space<vmem>>, %arg4: memref<1x128xf32, #tpu.memory_space<vmem>>) attributes {dimension_semantics = [#tpu.dimension_semantics<parallel>, #tpu.dimension_semantics<parallel>], iteration_bounds = array<i64: 2, 1>, scalar_prefetch = 0 : i64, scratch_operands = 0 : i64, tpu.core_type = #tpu.core_type<tc>, window_params = [{transform_indices = @transform_0, window_bounds = array<i64: 1, 1>}, {transform_indices = @transform_1, window_bounds = array<i64: 1, 16, 16>}, {transform_indices = @transform_2, window_bounds = array<i64: 1, 128>}]} {
    %c0 = arith.constant 0 : index
    %c0_0 = arith.constant 0 : index
    %0 = memref.load %arg2[%c0, %c0_0] : memref<1x1xf32, #tpu.memory_space<smem>>
    %c0_1 = arith.constant 0 : index
    %c0_2 = arith.constant 0 : index
    %c0_3 = arith.constant 0 : index
    %1 = vector.load %arg3[%c0_1, %c0_2, %c0_3] : memref<1x16x16xf32, #tpu.memory_space<vmem>>, vector<1x16x16xf32>
    %2 = vector.shape_cast %1 : vector<1x16x16xf32> to vector<16x16xf32>
    %3 = tpu.iota {dimensions = array<i32: 0>} : vector<16x16xi32>
    %c16_i32 = arith.constant 16 : i32
    %4 = arith.muli %arg1, %c16_i32 : i32
    %5 = vector.broadcast %4 : i32 to vector<16x16xi32>
    %6 = arith.addi %3, %5 : vector<16x16xi32>
    %7 = vector.broadcast %0 : f32 to vector<16x16xf32>
    %8 = arith.cmpf oge, %2, %7 : vector<16x16xf32>
    %c16_i32_4 = arith.constant 16 : i32
    %9 = vector.broadcast %c16_i32_4 : i32 to vector<16x16xi32>
    %10 = arith.cmpi slt, %6, %9 : vector<16x16xi32>
    %11 = arith.andi %8, %10 : vector<16x16xi1>
    %cst = arith.constant 0.000000e+00 : f32
    %12 = vector.broadcast %cst : f32 to vector<16x16xf32>
    %13 = arith.select %11, %2, %12 : vector<16x16xi1>, vector<16x16xf32>
    %14 = vector.shape_cast %13 : vector<16x16xf32> to vector<1x16x16xf32>
    %cst_5 = arith.constant dense<0.000000e+00> : vector<1xf32>
    %15 = vector.multi_reduction <add>, %14, %cst_5 [1, 2] : vector<1x16x16xf32> to vector<1xf32>
    %16 = vector.shape_cast %15 : vector<1xf32> to vector<1x1x1xf32>
    %17 = vector.extract %16[0, 0, 0] : f32 from vector<1x1x1xf32>
    %18 = arith.extui %11 : vector<16x16xi1> to vector<16x16xi32>
    %19 = arith.sitofp %18 : vector<16x16xi32> to vector<16x16xf32>
    %20 = vector.shape_cast %19 : vector<16x16xf32> to vector<1x16x16xf32>
    %cst_6 = arith.constant dense<0.000000e+00> : vector<1xf32>
    %21 = vector.multi_reduction <add>, %20, %cst_6 [1, 2] : vector<1x16x16xf32> to vector<1xf32>
    %22 = vector.shape_cast %21 : vector<1xf32> to vector<1x1x1xf32>
    %23 = vector.extract %22[0, 0, 0] : f32 from vector<1x1x1xf32>
    %24 = tpu.iota {dimensions = array<i32: 1>} : vector<1x128xi32>
    %c0_i32 = arith.constant 0 : i32
    %25 = vector.broadcast %c0_i32 : i32 to vector<1x128xi32>
    %26 = arith.cmpi eq, %24, %25 : vector<1x128xi32>
    %cst_7 = arith.constant 0.000000e+00 : f32
    %27 = vector.broadcast %17 : f32 to vector<1x128xf32>
    %28 = vector.broadcast %cst_7 : f32 to vector<1x128xf32>
    %29 = arith.select %26, %27, %28 : vector<1x128xi1>, vector<1x128xf32>
    %c1_i32 = arith.constant 1 : i32
    %30 = vector.broadcast %c1_i32 : i32 to vector<1x128xi32>
    %31 = arith.cmpi eq, %24, %30 : vector<1x128xi32>
    %cst_8 = arith.constant 0.000000e+00 : f32
    %32 = vector.broadcast %23 : f32 to vector<1x128xf32>
    %33 = vector.broadcast %cst_8 : f32 to vector<1x128xf32>
    %34 = arith.select %31, %32, %33 : vector<1x128xi1>, vector<1x128xf32>
    %35 = arith.addf %29, %34 : vector<1x128xf32>
    %c0_9 = arith.constant 0 : index
    %c0_10 = arith.constant 0 : index
    %36 = vector.load %arg4[%c0_9, %c0_10] : memref<1x128xf32, #tpu.memory_space<vmem>>, vector<1x128xf32>
    tpu.vector_store %arg4[%c0_9, %c0_10], %35 {strides = array<i32>} : memref<1x128xf32, #tpu.memory_space<vmem>>, vector<1x128xf32>,
    return
  }
  func.func @transform_0(%arg0: i32, %arg1: i32) -> (i32, i32) {
    %c0_i32 = arith.constant 0 : i32
    %c0_i32_0 = arith.constant 0 : i32
    %c0_i32_1 = arith.constant 0 : i32
    return %c0_i32, %c0_i32_0 : i32, i32
  }
  func.func @transform_1(%arg0: i32, %arg1: i32) -> (i32, i32, i32) {
    %c0_i32 = arith.constant 0 : i32
    %c0_i32_0 = arith.constant 0 : i32
    return %arg0, %arg1, %c0_i32 : i32, i32, i32
  }
  func.func @transform_2(%arg0: i32, %arg1: i32) -> (i32, i32) {
    %c1_i32 = arith.constant 1 : i32
    %0 = arith.muli %arg0, %c1_i32 : i32
    %1 = arith.addi %0, %arg1 : i32
    %c0_i32 = arith.constant 0 : i32
    %c0_i32_0 = arith.constant 0 : i32
    return %c0_i32, %1 : i32, i32
  }
}

</mosaic_0001>

<bundles_post_ra>
// kernel: _ohem_forward.3
= control target key start
LH: loop header
LB: loop body
LE: loop exit
PB: predicated region body
PF: predicated region fallthrough
CT: control target
= control target key end

     0   :  { %s618_s0 = inlined_call_operand.<no memory space> [shape: f32[1,1], index: 0, kind: input, shape index: {}]   ;;  %s619_s1 = inlined_call_operand.hbm [shape: f32[2,16,16], index: 1, kind: input, shape index: {}]   ;;  %s620_s2 = inlined_call_operand.vmem [shape: f32[1,256], index: 2, kind: output, shape index: {}]  }
   0x1   :  { %7 = sst [smem:[#allocation2]] %s618_s0 }
   0x2   :  { %8 = vsyncpa [#allocation4], 0 }
   0x3   :  { %10 = vsyncpa [#allocation4 + $0x1], 0  ;;  %s494_s11 = smov 0   ;;  %s496_s12 = smov 0  }
   0x4   :  { %s498_s13 = smov 0   ;;  %s500_s14 = smov 0  }
   0x5   :  { %s502_s15 = smov 0   ;;  %s504_s16 = smov 0  }
   0x6 LB: > { %s314_s0 = sadd.s32 4294967295, %s470_s16   ;;  %s28_s17 = sadd.s32 1, %s466_s15  ;;  %s470_s16 = sphi %s504_s16, %s16_s16   ;;  %s466_s15 = sphi %s502_s15, %s628_s15   ;;  %s462_s14 = sphi %s500_s14, %s627_s14   ;;  %s458_s13 = sphi %s498_s13, %s626_s13   ;;  %s454_s12 = sphi %s496_s12, %s625_s12   ;;  %s450_s11 = sphi %s494_s11, %s624_s11  }
   0x7   : > { %p30_p0 = scmp.ge.s32.totalorder %s28_s17, 2  ;;  %s58_s18 = sadd.s32 1, %s458_s13 }
   0x8   : > { %p65_p1 = scmp.ne.s32.totalorder %s458_s13, %s454_s12  ;;  %p66_p2 = scmp.eq.s32.totalorder %s470_s16, 0 }
   0x9   : > { %s630_s17 = smov (%p30_p0, %s28_s17), 0  ;;  %p71_p4 = scmp.ne.s32.totalorder %s454_s12, %s450_s11 }
   0xa   : > { %p530_p3 = por %p66_p2, %p65_p1  ;;  %s53_s20 = ssub.s32 %s466_s15, %s630_s17 }
   0xb   : > { %p72_p5 = scmp.eq.s32.totalorder %s314_s0, 0  ;;  %p56_p6 = scmp.eq.s32.totalorder %s53_s20, 0 }
   0xc   : > { %p338_p8 = scmp.lt.s32.totalorder %s470_s16, 2  ;;  %s126_s23 = sand.u32 1, %s458_s13  }
   0xd   : > { %p537_p7 = por %p72_p5, %p71_p4  ;;  %s327_s24 = sshll.u32 %s466_s15, 8 }
   0xe   : > { %s543_s22 = scalar_select %p56_p6, %s458_s13, %s58_s18  }
   0xf   : > { %s318_s25 = sshll.u32 %s126_s23, 4  ;;  %s550_s28 = scalar_lea.hbm %s619_s1, %s327_s24 }
  0x10   : > { %s130_s29 = scalar_lea.vmem [#allocation3], %s318_s25  ;;  %p554_p9 = pnand %p338_p8, %p530_p3 }
  0x11   : > { %s139_s30 = sshll.u32 %s130_s29, 4  ;;  %s560_s4 = scalar_lea.sflag [#allocation4], %s126_s23  ;;  %s558_s30 = int_to_ptr.vmem [resolvable:$true] %s139_s30 }
  0x12   : > { %s390_s5 = scalar_lea.hbm %s550_s28, 256  ;;  %p392_p11 = pneg %p554_p9 }
  0x13   : > { %p391_p10 = scmp.ne.s32.totalorder %s550_s28, %s390_s5  ;;  %s395_s8 = scalar_lea.hbm %s619_s1, 512 }
  0x14   : > { %p396_p0 = scmp.lt.u32.totalorder %s550_s28, %s619_s1  ;;  %p397_p1 = scmp.lt.u32.totalorder %s395_s8, %s390_s5 }
  0x15   : > { %p393_p12 = pnand %p392_p11, %p391_p10  ;;  %p399_p3 = scmp.lt.u32.totalorder %s390_s5, %s550_s28 }
  0x16   : > { %p398_p2 = por %p397_p1, %p396_p0 }
  0x17   : > { %p394_p13 = pneg %p393_p12 }
  0x18   : > { %p400_p4 = por %p399_p3, %p398_p2 }
  0x1a   : > { %p401_p5 = pnand %p400_p4, %p394_p13 }
  0x1c   : > { %404 = shalt.err (!%p401_p5)
}
  0x1d   : > { %s405_s11 = scalar_lea.vmem %s558_s30, 256  ;;  %s472_s0 = smov [#allocation3]  }
  0x1e   : > { %p406_p6 = scmp.ne.s32.totalorder %s558_s30, %s405_s11  ;;  %s410_s18 = sshll.u32 %s472_s0, 4  ;;  %s411_s18 = int_to_ptr.vmem [resolvable:$false] %s410_s18 }
  0x1f   : > { %s412_s19 = scalar_lea.vmem %s411_s18, 512  ;;  %p413_p12 = scmp.lt.s32.totalorder %s558_s30, %s411_s18 }
  0x20   : > { %p408_p8 = pnand %p406_p6, %p392_p11  ;;  %p414_p0 = scmp.lt.s32.totalorder %s412_s19, %s405_s11 }
  0x22   : > { %p409_p10 = pneg %p408_p8  ;;  %p415_p1 = por %p414_p0, %p413_p12 }
  0x24   : > { %p416_p2 = pnand %p415_p1, %p409_p10 }
  0x26   : > { %419 = shalt.err (!%p416_p2)
}
  0x27   : > { %s473_s20 = smov 128   ;;  %s474_s23 = smov 8  }
  0x28   : > { %337 = dma.hbm_to_vmem [thread:$0]  (!%p554_p9), %s550_s28, 256, %s558_s30, %s560_s4, %s473_s20, %s473_s20, %s474_s23  }
  0x29   : > { %p321_p11 = scmp.ge.s32.totalorder %s470_s16, 1  ;;  %p147_p13 = scmp.lt.s32.totalorder %s470_s16, 3 }
  0x2b   : > { %p148_p3 = pnand %p321_p11, %p147_p13 }
  0x2c   : > { %s153_s24 = sand.u32 (!%p148_p3), 1, %s454_s12  }
  0x2d   : > { %151 = sbr.rel (%p148_p3) target bundleno = 278 (0x116), region = 28  ;;  %s322_s25 = sshll.u32 (!%p148_p3), %s153_s24, 4 }
  0x2e   : > { %s154_s26 = scalar_lea.sflag (!%p148_p3), [#allocation4], %s153_s24  ;;  %s157_s27 = scalar_lea.vmem (!%p148_p3), [#allocation3], %s322_s25 }
  0x34   : > { %445 = dma.done.wait (%p537_p7), %s154_s26, 256  }
  0x35   : > { %447 = vsyncadd (%p537_p7), %s154_s26, 4294967040  ;;  %s183_s29 = sld [smem:[#allocation2]]  ;;  %v184_v0 = vld [vmem:[%s157_s27] sm:$0xff]  ;;  %v185_v1 = vld [vmem:[%s157_s27 + $0x8] sm:$0xff]  ;;  %vm202_vm0 = vcmask 130048   ;;  %v475_v5 = vmov 0.0   ;;  %v231_v28 = vlaneseq }
  0x36   : > { %p179_p7 = scmp.lt.s32.totalorder %s462_s14, 1 }
  0x37   : > { %v232_v29 = vand.u32 127, %v231_v28 }
  0x38   : > { %s632_s14 = smov (!%p179_p7, %s462_s14), 1 }
  0x39   : > { %vm233_vm3 = vcmp.eq.s32.totalorder %v232_v29, 0  ;;  %vm236_vm4 = vcmp.eq.s32.totalorder %v232_v29, 1  ;;  %s181_s4 = scalar_lea.vmem %s620_s2, %s632_s14 }
  0x3b   : > { %v193_v2 = vstv %s183_s29 }
  0x3c   : > { %vm194_vm1 = vcmp.ge.f32.partialorder %v184_v0, %v193_v2  ;;  %vm195_vm2 = vcmp.ge.f32.partialorder %v185_v1, %v193_v2 }
  0x3d   : > { %v200_v3 = vsel %vm194_vm1, %v184_v0, 0.0  ;;  %v201_v4 = vsel %vm195_vm2, %v185_v1, 0.0  ;;  %v323_v6 = vsel %vm194_vm1, 1.0, %v475_v5  ;;  %v324_v7 = vsel %vm195_vm2, 1.0, %v475_v5 }
  0x3e   : > { %v203_v8 = vsel %vm202_vm0, %v200_v3, 0.0  ;;  %v204_v9 = vsel %vm202_vm0, %v201_v4, 0.0  ;;  %v219_v10 = vsel %vm202_vm0, %v323_v6, 0.0  ;;  %v220_v11 = vsel %vm202_vm0, %v324_v7, 0.0 }
  0x3f   : > { %v205_v12 = vadd.f32 %v204_v9, %v203_v8  ;;  %v221_v13 = vadd.f32 %v220_v11, %v219_v10 }
  0x41   : > { %206 = vadd.xlane.f32.xlu0 %v205_v12 }
  0x45   : > { %222 = vadd.xlane.f32.xlu0 %v221_v13 }
  0xce   : > { %v207_v14 = vpop.xlane.xlu0 %206 }
  0xcf   : > { %v208_v15 = vrot.slane %v207_v14, 4 }
  0xd1   : > { %v209_v16 = vadd.f32 %v208_v15, %v207_v14 }
  0xd2   : > { %v223_v17 = vpop.xlane.xlu0 %222 }
  0xd3   : > { %v210_v18 = vrot.slane %v209_v16, 2  ;;  %v224_v19 = vrot.slane %v223_v17, 4 }
  0xd5   : > { %v225_v20 = vadd.f32 %v224_v19, %v223_v17  ;;  %v211_v21 = vadd.f32 %v210_v18, %v209_v16 }
  0xd7   : > { %v226_v22 = vrot.slane %v225_v20, 2  ;;  %v212_v23 = vrot.slane %v211_v21, 1 }
  0xd9   : > { %v227_v24 = vadd.f32 %v226_v22, %v225_v20  ;;  %v213_v25 = vadd.f32 %v212_v23, %v211_v21 }
  0xdb   : > { %328 = vpush %v213_v25  ;;  %v228_v26 = vrot.slane %v227_v24, 1 }
  0xdd   : > { %v229_v27 = vadd.f32 %v228_v26, %v227_v24 }
  0xdf   : > { %330 = vpush %v229_v27 }
 0x10c   : > { %s329_s21 = spop %328 }
 0x10d   : > { %v234_v30 = vstv %s329_s21 }
 0x10e   : > { %v235_v32 = vsel %vm233_vm3, %v234_v30, 0.0 }
 0x110   : > { %s331_s28 = spop %330 }
 0x111   : > { %v237_v31 = vstv %s331_s28 }
 0x112   : > { %v238_v33 = vsel %vm236_vm4, %v237_v31, 0.0 }
 0x113   : > { %v239_v34 = vadd.f32 %v238_v33, %v235_v32 }
 0x115   : > { %240 = vst [vmem:[%s181_s4] sm:$0x1] %v239_v34 }
 0x116 PF: > { %s16_s16 = sadd.s32 1, %s470_s16   ;;  %s624_s11 = smov %s454_s12 }
 0x117   : > { %p13_p9 = scmp.ge.s32.totalorder %s16_s16, 4   ;;  %s625_s12 = smov %s458_s13 }
 0x118   : > { %s626_s13 = smov %s543_s22  ;;  %s627_s14 = smov %s466_s15 }
 0x119   : > { %s628_s15 = smov %s630_s17  ;;  %15 = sbr.rel (!%p13_p9) target bundleno = 6 (0x6), region = 68 }
 0x120   :  { %261 = vsyncpa [#allocation4], 1 }
 0x121   :  { %263 = vsyncpa [#allocation4 + $0x1], 1 }

// kernel: _ohem_forward.2
= control target key start
LH: loop header
LB: loop body
LE: loop exit
PB: predicated region body
PF: predicated region fallthrough
CT: control target
= control target key end

     0   :  { %s1765_s0 = inlined_call_operand.hbm [shape: f32[2,4,16,16], index: 0, kind: input, shape index: {}]   ;;  %s1766_s1 = inlined_call_operand.hbm [shape: s32[2,16,16], index: 1, kind: input, shape index: {}]   ;;  %s1767_s2 = inlined_call_operand.vmem [shape: f32[2,16,16], index: 2, kind: output, shape index: {0}]   ;;  %s1768_s3 = inlined_call_operand.vmem [shape: f32[1,512], index: 3, kind: output, shape index: {1}]  }
   0x1   :  { %1772 = sst [smem:[#allocation10_spill]] %s1765_s0 }
   0x2   :  { %9 = vsyncpa [#allocation3], 0 }
   0x3   :  { %11 = vsyncpa [#allocation3 + $0x1], 0 }
   0x4   :  { %12 = vsyncpa [#allocation5], 0 }
   0x5   :  { %14 = vsyncpa [#allocation5 + $0x1], 0  ;;  %s1411_s12 = smov 0   ;;  %s1413_s13 = smov 0  }
   0x6   :  { %s1415_s14 = smov 0   ;;  %s1417_s15 = smov 0  }
   0x7   :  { %s1419_s16 = smov 0   ;;  %s1421_s17 = smov 0  }
   0x8   :  { %s1423_s18 = smov 0   ;;  %s1425_s19 = smov 0  }
   0x9 LB: > { %s1040_s20 = sadd.s32 4294967295, %s1383_s19   ;;  %s29_s21 = sadd.s32 1, %s1375_s17  ;;  %s1383_s19 = sphi %s1425_s19, %s20_s19   ;;  %s1379_s18 = sphi %s1423_s18, %s1792_s18   ;;  %s1375_s17 = sphi %s1421_s17, %s1791_s17   ;;  %s1371_s16 = sphi %s1419_s16, %s1790_s16   ;;  %s1367_s15 = sphi %s1417_s15, %s1789_s15   ;;  %s1363_s14 = sphi %s1415_s14, %s1788_s14   ;;  %s1359_s13 = sphi %s1413_s13, %s1787_s13   ;;  %s1355_s12 = sphi %s1411_s12, %s1786_s12  }
   0xa   : > { %p30_p0 = scmp.ge.s32.totalorder %s29_s21, 2  ;;  %s32_s22 = sadd.s32 1, %s1379_s18 }
   0xb   : > { %s41_s23 = sadd.s32 1, %s1363_s14  ;;  %p48_p1 = scmp.ne.s32.totalorder %s1363_s14, %s1359_s13 }
   0xc   : > { %s1794_s21 = smov (%p30_p0, %s29_s21), 0  ;;  %s1796_s22 = smov (!%p30_p0, %s32_s22), %s1379_s18 }
   0xd   : > { %1773 = sst [smem:[#allocation8_spill]] %s1794_s21  ;;  %s37_s24 = ssub.s32 %s1375_s17, %s1794_s21 }
   0xe   : > { %p49_p2 = scmp.eq.s32.totalorder %s1383_s19, 0  ;;  %p34_p3 = scmp.ge.s32.totalorder %s1796_s22, 2 }
   0xf   : > { %p54_p4 = scmp.ne.s32.totalorder %s1359_s13, %s1355_s12  ;;  %p55_p6 = scmp.eq.s32.totalorder %s1040_s20, 0 }
  0x10   : > { %p1462_p5 = por %p49_p2, %p48_p1  ;;  %s1798_s22 = smov (%p34_p3, %s1796_s22), 0 }
  0x11   : > { %1775 = sst [smem:[#allocation9_spill]] %s1798_s22  ;;  %p1468_p7 = por %p55_p6, %p54_p4 }
  0x12   : > { %s36_s27 = ssub.s32 %s1379_s18, %s1798_s22  ;;  %p1174_p8 = scmp.lt.s32.totalorder %s1383_s19, 4 }
  0x13   : > { %s1776_s26 = scalar_select %p1468_p7, 1, 0 }
  0x14   : > { %s38_s28 = sor.u32 %s37_s24, %s36_s27  ;;  %s1476_s29 = sand.u32 1, %s1363_s14  }
  0x15   : > { %p39_p9 = scmp.eq.s32.totalorder %s38_s28, 0  ;;  %s1046_s30 = sshll.u32 %s1476_s29, 5 }
  0x16   : > { %s1047_s4 = sshll.u32 %s1379_s18, 3  ;;  %s168_s8 = scalar_lea.vmem [#allocation2], %s1046_s30 }
  0x17   : > { %s1481_s5 = scalar_select %p39_p9, %s1363_s14, %s41_s23  }
  0x18   : > { %s173_s6 = sadd.s32 %s1375_s17, %s1047_s4  ;;  %s176_s9 = sshll.u32 %s168_s8, 4  ;;  %s1489_s9 = int_to_ptr.vmem [resolvable:$true] %s176_s9 }
  0x19   : > { %s1048_s7 = sshll.u32 %s173_s6, 7  ;;  %s1777_s0 = sld [smem:[#allocation10_spill]] }
  0x1a   : > { %p1495_p10 = pnand %p1174_p8, %p1462_p5  ;;  %s165_s23 = scalar_lea.sflag [#allocation3], %s1476_s29 }
  0x1c   : > { %p1255_p13 = pneg %p1495_p10 }
  0x1f   : > { %s1487_s12 = scalar_lea.hbm %s1777_s0, %s1048_s7  ;;  %s1258_s25 = scalar_lea.hbm %s1777_s0, 2048 }
  0x20   : > { %s1253_s24 = scalar_lea.hbm %s1487_s12, 512  ;;  %p1259_p2 = scmp.lt.u32.totalorder %s1487_s12, %s1777_s0 }
  0x21   : > { %p1254_p12 = scmp.ne.s32.totalorder %s1487_s12, %s1253_s24  ;;  %p1260_p3 = scmp.lt.u32.totalorder %s1258_s25, %s1253_s24 }
  0x22   : > { %p1262_p5 = scmp.lt.u32.totalorder %s1253_s24, %s1487_s12 }
  0x23   : > { %p1256_p0 = pnand %p1255_p13, %p1254_p12  ;;  %p1261_p4 = por %p1260_p3, %p1259_p2 }
  0x25   : > { %p1257_p1 = pneg %p1256_p0  ;;  %p1263_p6 = por %p1262_p5, %p1261_p4 }
  0x27   : > { %p1264_p8 = pnand %p1263_p6, %p1257_p1 }
  0x29   : > { %1267 = shalt.err (!%p1264_p8)
}
  0x2a   : > { %s1268_s6 = scalar_lea.vmem %s1489_s9, 512  ;;  %s1385_s7 = smov [#allocation2]  }
  0x2b   : > { %p1269_p9 = scmp.ne.s32.totalorder %s1489_s9, %s1268_s6  ;;  %s1273_s8 = sshll.u32 %s1385_s7, 4  ;;  %s1274_s8 = int_to_ptr.vmem [resolvable:$false] %s1273_s8 }
  0x2c   : > { %s1275_s10 = scalar_lea.vmem %s1274_s8, 1024  ;;  %p1276_p11 = scmp.lt.s32.totalorder %s1489_s9, %s1274_s8 }
  0x2d   : > { %p1271_p12 = pnand %p1269_p9, %p1255_p13  ;;  %p1277_p2 = scmp.lt.s32.totalorder %s1275_s10, %s1268_s6 }
  0x2f   : > { %p1272_p0 = pneg %p1271_p12  ;;  %p1278_p3 = por %p1277_p2, %p1276_p11 }
  0x31   : > { %p1279_p4 = pnand %p1278_p3, %p1272_p0 }
  0x33   : > { %1282 = shalt.err (!%p1279_p4)
}
  0x34   : > { %s1386_s11 = smov 256   ;;  %s1387_s24 = smov 128  }
  0x35   : > { %s1388_s27 = smov 8   ;;  %p204_p11 = scmp.lt.s32.totalorder %s1383_s19, 5 }
  0x36   : > { %1170 = dma.hbm_to_vmem [thread:$0]  (!%p1495_p10), %s1487_s12, 512, %s1489_s9, %s165_s23, %s1386_s11, %s1387_s24, %s1388_s27  }
  0x37   : > { %s1049_s28 = sshll.u32 %s1476_s29, 3  ;;  %s1050_s25 = sshll.u32 %s1379_s18, 1 }
  0x38   : > { %p1779_p1 = scmp.ge.s32.totalorder %s1383_s19, 1  ;;  %s195_s4 = sadd.s32 %s1375_s17, %s1050_s25 }
  0x39   : > { %s190_s6 = scalar_lea.vmem [#allocation4], %s1049_s28  ;;  %s1051_s8 = sshll.u32 %s195_s4, 7 }
  0x3a   : > { %p1533_p5 = pnand %p1779_p1, %p204_p11  ;;  %s199_s7 = sshll.u32 %s190_s6, 4  ;;  %s1538_s7 = int_to_ptr.vmem [resolvable:$true] %s199_s7 }
  0x3b   : > { %s197_s22 = scalar_lea.hbm %s1766_s1, %s1051_s8  ;;  %s187_s21 = scalar_lea.sflag [#allocation5], %s1476_s29 }
  0x3c   : > { %s1283_s9 = scalar_lea.hbm %s197_s22, 128  ;;  %s1288_s11 = scalar_lea.hbm %s1766_s1, 512 }
  0x3d   : > { %p1284_p6 = scmp.ne.s32.totalorder %s197_s22, %s1283_s9  ;;  %p1289_p12 = scmp.lt.u32.totalorder %s197_s22, %s1766_s1 }
  0x3e   : > { %p1290_p0 = scmp.lt.u32.totalorder %s1288_s11, %s1283_s9  ;;  %p1292_p3 = scmp.lt.u32.totalorder %s1283_s9, %s197_s22 }
  0x3f   : > { %p1286_p8 = pnand %p1284_p6, %p1255_p13 }
  0x40   : > { %p1291_p2 = por %p1290_p0, %p1289_p12 }
  0x41   : > { %p1287_p9 = pneg %p1286_p8 }
  0x42   : > { %p1293_p4 = por %p1292_p3, %p1291_p2 }
  0x44   : > { %p1294_p11 = pnand %p1293_p4, %p1287_p9 }
  0x46   : > { %1297 = shalt.err (!%p1294_p11)
}
  0x47   : > { %s1298_s0 = scalar_lea.vmem %s1538_s7, 128  ;;  %s1389_s29 = smov [#allocation4]  }
  0x48   : > { %p1299_p1 = scmp.ne.s32.totalorder %s1538_s7, %s1298_s0  ;;  %s1303_s28 = sshll.u32 %s1389_s29, 4  ;;  %s1304_s28 = int_to_ptr.vmem [resolvable:$false] %s1303_s28 }
  0x49   : > { %s1305_s25 = scalar_lea.vmem %s1304_s28, 256  ;;  %p1306_p7 = scmp.lt.s32.totalorder %s1538_s7, %s1304_s28 }
  0x4a   : > { %p1301_p6 = pnand %p1299_p1, %p1255_p13  ;;  %p1307_p12 = scmp.lt.s32.totalorder %s1305_s25, %s1298_s0 }
  0x4c   : > { %p1302_p8 = pneg %p1301_p6  ;;  %p1308_p0 = por %p1307_p12, %p1306_p7 }
  0x4e   : > { %p1309_p2 = pnand %p1308_p0, %p1302_p8 }
  0x50   : > { %1312 = shalt.err (!%p1309_p2)
}
  0x51   : > { %1173 = dma.hbm_to_vmem [thread:$0]  (!%p1495_p10), %s197_s22, 128, %s1538_s7, %s187_s21  }
  0x52   : > { %208 = sbr.rel (%p1533_p5) target bundleno = 421 (0x1a5), region = 28  ;;  %s210_s4 = sand.u32 (!%p1533_p5), 1, %s1359_s13  }
  0x53   : > { %s1053_s6 = sshll.u32 (!%p1533_p5), %s210_s4, 5  ;;  %s211_s8 = scalar_lea.sflag (!%p1533_p5), [#allocation3], %s210_s4 }
  0x54   : > { %s214_s10 = scalar_lea.vmem (!%p1533_p5), [#allocation2], %s1053_s6  ;;  %p1781_p13 = scmp.ne.s32.totalorder (!%p1533_p5), %s1776_s26, 0 }
  0x59   : > { %1346 = dma.done.wait (%p1781_p13), %s211_s8, 512  }
  0x5a   : > { %1348 = vsyncadd (%p1781_p13), %s211_s8, 4294966784  ;;  %s1054_s9 = sshll.u32 %s210_s4, 3  ;;  %s220_s12 = scalar_lea.sflag [#allocation5], %s210_s4 }
  0x5b   : > { %s223_s20 = scalar_lea.vmem [#allocation4], %s1054_s9 }
  0x5c   : > { %1350 = dma.done.wait (%p1781_p13), %s220_s12, 128  }
  0x5d   : > { %1352 = vsyncadd (%p1781_p13), %s220_s12, 4294967168  ;;  %v284_v0 = vld [vmem:[%s214_s10] sm:$0xff]  ;;  %v1059_v1 = vld [vmem:[%s214_s10 + $0x8] sm:$0xff]  ;;  %v275_v10 = vlaneseq  ;;  %s1058_s21 = sshll.u32 %s1367_s15, 3  ;;  %p259_p7 = scmp.lt.s32.totalorder %s1371_s16, 1  ;;  %vm324_vm7 = vcmask 130048  }
  0x5e   : > { %v287_v2 = vmax.f32 %v284_v0, %v1059_v1  ;;  %v1060_v3 = vld [vmem:[%s214_s10 + $0x10] sm:$0xff]  ;;  %v1061_v4 = vld [vmem:[%s214_s10 + $0x18] sm:$0xff]  ;;  %v278_v17 = vstv %s1058_s21  ;;  %v274_v19 = vld [vmem:[%s223_s20] sm:$0xff]  ;;  %p261_p10 = scmp.lt.s32.totalorder %s1367_s15, 1  ;;  %v1390_v39 = vmov 0.0  }
  0x5f   : > { %v276_v16 = vshrl.u32 %v275_v10, 7  ;;  %vm280_vm0 = vcmp.ne.s32.totalorder %v274_v19, 255  ;;  %s260_s22 = scalar_select %p259_p7, %s1371_s16, 1 }
  0x60   : > { %v290_v5 = vmax.f32 %v287_v2, %v1060_v3  ;;  %s262_s26 = scalar_select %p261_p10, %s1367_s15, 1 }
  0x61   : > { %v279_v18 = vadd.s32 %v278_v17, %v276_v16  ;;  %s1055_s30 = sshll.u32 %s260_s22, 1 }
  0x62   : > { %v293_v6 = vmax.f32 %v290_v5, %v1061_v4  ;;  %s264_s7 = sadd.s32 %s1055_s30, %s262_s26 }
  0x63   : > { %vm281_vm1 = vcmp.lt.s32.totalorder %v279_v18, 16  ;;  %s1056_s23 = sshll.u32 %s264_s7, 3 }
  0x64   : > { %v294_v7 = vsub.f32 %v284_v0, %v293_v6  ;;  %v300_v8 = vsub.f32 %v1059_v1, %v293_v6  ;;  %v306_v9 = vsub.f32 %v1060_v3, %v293_v6  ;;  %v312_v11 = vsub.f32 %v1061_v4, %v293_v6  ;;  %vm1575_vm2 = vmand %vm280_vm0, %vm281_vm1  ;;  %s266_s27 = scalar_lea.vmem %s1767_s2, %s1056_s23 }
  0x65   : > { %v283_v27 = vsel %vm1575_vm2, %v274_v19, 0 }
  0x66   : > { %v295_v12 = vmul.f32 1.442695, %v294_v7  ;;  %v301_v13 = vmul.f32 1.442695, %v300_v8  ;;  %v307_v14 = vmul.f32 1.442695, %v306_v9 }
  0x67   : > { %v313_v15 = vmul.f32 1.442695, %v312_v11  ;;  %vm298_vm3 = vcmp.eq.s32.totalorder %v283_v27, 0  ;;  %vm304_vm4 = vcmp.eq.s32.totalorder %v283_v27, 1  ;;  %vm310_vm5 = vcmp.eq.s32.totalorder %v283_v27, 2 }
  0x68   : > { %1243 = vpow2.f32 %v295_v12  ;;  %v299_v29 = vsel %vm298_vm3, %v284_v0, 0.0  ;;  %vm316_vm6 = vcmp.eq.s32.totalorder %v283_v27, 3 }
  0x69   : > { %1245 = vpow2.f32 %v301_v13  ;;  %v305_v30 = vsel %vm304_vm4, %v1059_v1, %v299_v29 }
  0x6a   : > { %1247 = vpow2.f32 %v307_v14  ;;  %v311_v31 = vsel %vm310_vm5, %v1060_v3, %v305_v30 }
  0x6b   : > { %1249 = vpow2.f32 %v313_v15  ;;  %v317_v34 = vsel %vm316_vm6, %v1061_v4, %v311_v31 }
  0x72   : > { %v1244_v20 = vpop.eup %1243 }
  0x73   : > { %v1246_v21 = vpop.eup %1245 }
  0x74   : > { %v1248_v22 = vpop.eup %1247  ;;  %v303_v24 = vadd.f32 %v1246_v21, %v1244_v20 }
  0x75   : > { %v1250_v25 = vpop.eup %1249 }
  0x76   : > { %v309_v26 = vadd.f32 %v1248_v22, %v303_v24 }
  0x78   : > { %v315_v28 = vadd.f32 %v1250_v25, %v309_v26 }
  0x7a   : > { %1251 = vlog2.f32 %v315_v28 }
  0x84   : > { %v1252_v32 = vpop.eup %1251 }
  0x85   : > { %v319_v33 = vmul.f32 0.6931472, %v1252_v32 }
  0x87   : > { %v320_v35 = vadd.f32 %v319_v33, %v293_v6 }
  0x89   : > { %v321_v36 = vsub.f32 %v320_v35, %v317_v34 }
  0x8b   : > { %v322_v37 = vmax.f32 %v321_v36, 0.0 }
  0x8d   : > { %v1590_v38 = vsel %vm1575_vm2, %v322_v37, -1.0 }
  0x8e   : > { %325 = vst.msk [vmem:[%s266_s27] sm:$0xff] %vm324_vm7, %v1590_v38  ;;  %vm362_vm8 = vcmp.ge.f32.partialorder %v1590_v38, 0.022292184  ;;  %vm328_vm9 = vcmp.ge.f32.partialorder %v1590_v38, 0.0  ;;  %vm379_vm10 = vcmp.ge.f32.partialorder %v1590_v38, 0.033438276 }
  0x8f   : > { %v1064_v40 = vsel %vm362_vm8, 1.0, %v1390_v39  ;;  %v1062_v41 = vsel %vm328_vm9, 1.0, %v1390_v39  ;;  %v1065_v42 = vsel %vm379_vm10, 1.0, %v1390_v39  ;;  %vm345_vm11 = vcmp.ge.f32.partialorder %v1590_v38, 0.011146092 }
  0x90   : > { %v365_v43 = vsel %vm324_vm7, %v1064_v40, 0.0  ;;  %v331_v44 = vsel %vm324_vm7, %v1062_v41, 0.0  ;;  %v1063_v45 = vsel %vm345_vm11, 1.0, %v1390_v39  ;;  %vm413_vm12 = vcmp.ge.f32.partialorder %v1590_v38, 0.05573046 }
  0x91   : > { %366 = vadd.xlane.f32.xlu1 %v365_v43  ;;  %332 = vadd.xlane.f32.xlu0 %v331_v44  ;;  %vm396_vm13 = vcmp.ge.f32.partialorder %v1590_v38, 0.044584367  ;;  %v382_v46 = vsel %vm324_vm7, %v1065_v42, 0.0  ;;  %v348_v47 = vsel %vm324_vm7, %v1063_v45, 0.0  ;;  %v1067_v48 = vsel %vm413_vm12, 1.0, %v1390_v39 }
  0x92   : > { %v1066_v49 = vsel %vm396_vm13, 1.0, %v1390_v39  ;;  %vm447_vm14 = vcmp.ge.f32.partialorder %v1590_v38, 0.078022644  ;;  %vm430_vm15 = vcmp.ge.f32.partialorder %v1590_v38, 0.06687655  ;;  %v416_v50 = vsel %vm324_vm7, %v1067_v48, 0.0 }
  0x93   : > { %v399_v51 = vsel %vm324_vm7, %v1066_v49, 0.0  ;;  %v1069_v52 = vsel %vm447_vm14, 1.0, %v1390_v39  ;;  %v1068_v53 = vsel %vm430_vm15, 1.0, %v1390_v39  ;;  %vm481_vm0 = vcmp.ge.f32.partialorder %v1590_v38, 0.100314826 }
  0x94   : > { %vm464_vm1 = vcmp.ge.f32.partialorder %v1590_v38, 0.089168735  ;;  %v450_v54 = vsel %vm324_vm7, %v1069_v52, 0.0  ;;  %v433_v55 = vsel %vm324_vm7, %v1068_v53, 0.0  ;;  %v1071_v56 = vsel %vm481_vm0, 1.0, %v1390_v39 }
  0x95   : > { %383 = vadd.xlane.f32.xlu1 %v382_v46  ;;  %349 = vadd.xlane.f32.xlu0 %v348_v47  ;;  %v1070_v57 = vsel %vm464_vm1, 1.0, %v1390_v39  ;;  %vm515_vm2 = vcmp.ge.f32.partialorder %v1590_v38, 0.122607015  ;;  %vm498_vm3 = vcmp.ge.f32.partialorder %v1590_v38, 0.11146092  ;;  %v484_v58 = vsel %vm324_vm7, %v1071_v56, 0.0 }
  0x96   : > { %v467_v59 = vsel %vm324_vm7, %v1070_v57, 0.0  ;;  %v1073_v60 = vsel %vm515_vm2, 1.0, %v1390_v39  ;;  %v1072_v61 = vsel %vm498_vm3, 1.0, %v1390_v39  ;;  %vm549_vm4 = vcmp.ge.f32.partialorder %v1590_v38, 0.14489919 }
  0x97   : > { %vm532_vm5 = vcmp.ge.f32.partialorder %v1590_v38, 0.1337531  ;;  %v518_v62 = vsel %vm324_vm7, %v1073_v60, 0.0  ;;  %v501_v63 = vsel %vm324_vm7, %v1072_v61, 0.0  ;;  %v1075_v0 = vsel %vm549_vm4, 1.0, %v1390_v39 }
  0x98   : > { %v1074_v1 = vsel %vm532_vm5, 1.0, %v1390_v39  ;;  %vm583_vm6 = vcmp.ge.f32.partialorder %v1590_v38, 0.16719139  ;;  %vm566_vm8 = vcmp.ge.f32.partialorder %v1590_v38, 0.15604529  ;;  %v552_v2 = vsel %vm324_vm7, %v1075_v0, 0.0 }
  0x99   : > { %417 = vadd.xlane.f32.xlu1 %v416_v50  ;;  %400 = vadd.xlane.f32.xlu0 %v399_v51  ;;  %v535_v3 = vsel %vm324_vm7, %v1074_v1, 0.0  ;;  %vm872_vm9 = vcmp.ge.f32.partialorder %v1590_v38, 0.35667494  ;;  %v1077_v4 = vsel %vm583_vm6, 1.0, %v1390_v39  ;;  %v1076_v5 = vsel %vm566_vm8, 1.0, %v1390_v39 }
  0x9a   : > { %v1094_v6 = vsel %vm872_vm9, 1.0, %v1390_v39  ;;  %vm617_vm10 = vcmp.ge.f32.partialorder %v1590_v38, 0.18948357  ;;  %vm600_vm11 = vcmp.ge.f32.partialorder %v1590_v38, 0.17833747  ;;  %v586_v8 = vsel %vm324_vm7, %v1077_v4, 0.0 }
  0x9b   : > { %v1645_v7 = vsel %vm324_vm7, %v1094_v6, 0.0  ;;  %v569_v9 = vsel %vm324_vm7, %v1076_v5, 0.0  ;;  %v1079_v11 = vsel %vm617_vm10, 1.0, %v1390_v39  ;;  %v1078_v12 = vsel %vm600_vm11, 1.0, %v1390_v39 }
  0x9c   : > { %vm651_vm12 = vcmp.ge.f32.partialorder %v1590_v38, 0.21177575  ;;  %vm634_vm13 = vcmp.ge.f32.partialorder %v1590_v38, 0.20062965  ;;  %v620_v13 = vsel %vm324_vm7, %v1079_v11, 0.0  ;;  %v603_v14 = vsel %vm324_vm7, %v1078_v12, 0.0 }
  0x9d   : > { %451 = vadd.xlane.f32.xlu1 %v450_v54  ;;  %434 = vadd.xlane.f32.xlu0 %v433_v55  ;;  %v1081_v15 = vsel %vm651_vm12, 1.0, %v1390_v39  ;;  %v1080_v16 = vsel %vm634_vm13, 1.0, %v1390_v39  ;;  %vm685_vm14 = vcmp.ge.f32.partialorder %v1590_v38, 0.23406793  ;;  %vm668_vm15 = vcmp.ge.f32.partialorder %v1590_v38, 0.22292183 }
  0x9e   : > { %v654_v17 = vsel %vm324_vm7, %v1081_v15, 0.0  ;;  %v637_v18 = vsel %vm324_vm7, %v1080_v16, 0.0  ;;  %v1083_v19 = vsel %vm685_vm14, 1.0, %v1390_v39  ;;  %v1082_v20 = vsel %vm668_vm15, 1.0, %v1390_v39 }
  0x9f   : > { %vm719_vm0 = vcmp.ge.f32.partialorder %v1590_v38, 0.2563601  ;;  %vm702_vm1 = vcmp.ge.f32.partialorder %v1590_v38, 0.24521403  ;;  %v688_v21 = vsel %vm324_vm7, %v1083_v19, 0.0  ;;  %v671_v22 = vsel %vm324_vm7, %v1082_v20, 0.0 }
  0xa0   : > { %v1085_v23 = vsel %vm719_vm0, 1.0, %v1390_v39  ;;  %v1084_v24 = vsel %vm702_vm1, 1.0, %v1390_v39  ;;  %vm753_vm2 = vcmp.ge.f32.partialorder %v1590_v38, 0.2786523  ;;  %vm736_vm3 = vcmp.ge.f32.partialorder %v1590_v38, 0.2675062 }
  0xa1   : > { %485 = vadd.xlane.f32.xlu1 %v484_v58  ;;  %468 = vadd.xlane.f32.xlu0 %v467_v59  ;;  %v722_v25 = vsel %vm324_vm7, %v1085_v23, 0.0  ;;  %v705_v26 = vsel %vm324_vm7, %v1084_v24, 0.0  ;;  %v1087_v27 = vsel %vm753_vm2, 1.0, %v1390_v39  ;;  %v1086_v28 = vsel %vm736_vm3, 1.0, %v1390_v39 }
  0xa2   : > { %vm787_vm4 = vcmp.ge.f32.partialorder %v1590_v38, 0.30094448  ;;  %vm770_vm5 = vcmp.ge.f32.partialorder %v1590_v38, 0.28979838  ;;  %v756_v29 = vsel %vm324_vm7, %v1087_v27, 0.0  ;;  %v739_v30 = vsel %vm324_vm7, %v1086_v28, 0.0 }
  0xa3   : > { %v1089_v31 = vsel %vm787_vm4, 1.0, %v1390_v39  ;;  %v1088_v32 = vsel %vm770_vm5, 1.0, %v1390_v39  ;;  %vm821_vm6 = vcmp.ge.f32.partialorder %v1590_v38, 0.32323667  ;;  %vm804_vm8 = vcmp.ge.f32.partialorder %v1590_v38, 0.31209058 }
  0xa4   : > { %v790_v33 = vsel %vm324_vm7, %v1089_v31, 0.0  ;;  %v773_v34 = vsel %vm324_vm7, %v1088_v32, 0.0  ;;  %v1091_v35 = vsel %vm821_vm6, 1.0, %v1390_v39  ;;  %v1090_v36 = vsel %vm804_vm8, 1.0, %v1390_v39 }
  0xa5   : > { %519 = vadd.xlane.f32.xlu1 %v518_v62  ;;  %502 = vadd.xlane.f32.xlu0 %v501_v63  ;;  %vm855_vm9 = vcmp.ge.f32.partialorder %v1590_v38, 0.34552884  ;;  %vm838_vm10 = vcmp.ge.f32.partialorder %v1590_v38, 0.33438277  ;;  %v824_v37 = vsel %vm324_vm7, %v1091_v35, 0.0  ;;  %v807_v40 = vsel %vm324_vm7, %v1090_v36, 0.0 }
  0xa6   : > { %v1093_v41 = vsel %vm855_vm9, 1.0, %v1390_v39  ;;  %v1092_v42 = vsel %vm838_vm10, 1.0, %v1390_v39 }
  0xa7   : > { %v858_v43 = vsel %vm324_vm7, %v1093_v41, 0.0  ;;  %v841_v44 = vsel %vm324_vm7, %v1092_v42, 0.0 }
  0xa9   : > { %553 = vadd.xlane.f32.xlu1 %v552_v2  ;;  %536 = vadd.xlane.f32.xlu0 %v535_v3 }
  0xad   : > { %587 = vadd.xlane.f32.xlu1 %v586_v8  ;;  %570 = vadd.xlane.f32.xlu0 %v569_v9 }
  0xb1   : > { %621 = vadd.xlane.f32.xlu1 %v620_v13  ;;  %604 = vadd.xlane.f32.xlu0 %v603_v14 }
  0xb5   : > { %655 = vadd.xlane.f32.xlu1 %v654_v17  ;;  %638 = vadd.xlane.f32.xlu0 %v637_v18 }
  0xb9   : > { %689 = vadd.xlane.f32.xlu1 %v688_v21  ;;  %672 = vadd.xlane.f32.xlu0 %v671_v22 }
  0xbd   : > { %723 = vadd.xlane.f32.xlu1 %v722_v25  ;;  %706 = vadd.xlane.f32.xlu0 %v705_v26 }
  0xc1   : > { %757 = vadd.xlane.f32.xlu1 %v756_v29  ;;  %740 = vadd.xlane.f32.xlu0 %v739_v30 }
  0xc5   : > { %791 = vadd.xlane.f32.xlu1 %v790_v33  ;;  %774 = vadd.xlane.f32.xlu0 %v773_v34 }
  0xc9   : > { %825 = vadd.xlane.f32.xlu1 %v824_v37  ;;  %808 = vadd.xlane.f32.xlu0 %v807_v40 }
  0xcd   : > { %859 = vadd.xlane.f32.xlu1 %v858_v43  ;;  %842 = vadd.xlane.f32.xlu0 %v841_v44 }
  0xd1   : > { %876 = vadd.xlane.f32.xlu0 %v1645_v7 }
 0x11e   : > { %v367_v38 = vpop.xlane.xlu1 %366  ;;  %v333_v45 = vpop.xlane.xlu0 %332 }
 0x11f   : > { %v368_v46 = vrot.slane %v367_v38, 4  ;;  %v334_v47 = vrot.slane %v333_v45, 4 }
 0x121   : > { %v369_v48 = vadd.f32 %v368_v46, %v367_v38  ;;  %v335_v49 = vadd.f32 %v334_v47, %v333_v45 }
 0x122   : > { %v384_v50 = vpop.xlane.xlu1 %383  ;;  %v350_v51 = vpop.xlane.xlu0 %349 }
 0x123   : > { %v370_v52 = vrot.slane %v369_v48, 2  ;;  %v336_v39 = vrot.slane %v335_v49, 2  ;;  %v385_v53 = vrot.slane %v384_v50, 4  ;;  %v351_v54 = vrot.slane %v350_v51, 4 }
 0x125   : > { %v386_v55 = vadd.f32 %v385_v53, %v384_v50  ;;  %v352_v56 = vadd.f32 %v351_v54, %v350_v51  ;;  %v337_v57 = vadd.f32 %v336_v39, %v335_v49  ;;  %v371_v60 = vadd.f32 %v370_v52, %v369_v48 }
 0x126   : > { %v418_v58 = vpop.xlane.xlu1 %417  ;;  %v401_v59 = vpop.xlane.xlu0 %400 }
 0x127   : > { %v387_v61 = vrot.slane %v386_v55, 2  ;;  %v353_v62 = vrot.slane %v352_v56, 2  ;;  %v419_v63 = vrot.slane %v418_v58, 4  ;;  %v402_v0 = vrot.slane %v401_v59, 4 }
 0x128   : > { %v338_v1 = vrot.slane %v337_v57, 1  ;;  %v372_v9 = vrot.slane %v371_v60, 1 }
 0x129   : > { %v420_v2 = vadd.f32 %v419_v63, %v418_v58  ;;  %v403_v3 = vadd.f32 %v402_v0, %v401_v59  ;;  %v354_v4 = vadd.f32 %v353_v62, %v352_v56  ;;  %v388_v5 = vadd.f32 %v387_v61, %v386_v55 }
 0x12a   : > { %v452_v6 = vpop.xlane.xlu1 %451  ;;  %v435_v7 = vpop.xlane.xlu0 %434  ;;  %v339_v8 = vadd.f32 %v338_v1, %v337_v57  ;;  %v373_v24 = vadd.f32 %v372_v9, %v371_v60 }
 0x12b   : > { %v421_v11 = vrot.slane %v420_v2, 2  ;;  %v404_v12 = vrot.slane %v403_v3, 2  ;;  %v453_v13 = vrot.slane %v452_v6, 4  ;;  %v436_v14 = vrot.slane %v435_v7, 4 }
 0x12c   : > { %1097 = vpush %v339_v8  ;;  %v355_v15 = vrot.slane %v354_v4, 1  ;;  %v389_v16 = vrot.slane %v388_v5, 1 }
 0x12d   : > { %v454_v17 = vadd.f32 %v453_v13, %v452_v6  ;;  %v437_v18 = vadd.f32 %v436_v14, %v435_v7  ;;  %v405_v19 = vadd.f32 %v404_v12, %v403_v3  ;;  %v422_v20 = vadd.f32 %v421_v11, %v420_v2 }
 0x12e   : > { %v486_v21 = vpop.xlane.xlu1 %485  ;;  %v469_v22 = vpop.xlane.xlu0 %468  ;;  %v356_v23 = vadd.f32 %v355_v15, %v354_v4  ;;  %v390_v25 = vadd.f32 %v389_v16, %v388_v5 }
 0x12f   : > { %v455_v26 = vrot.slane %v454_v17, 2  ;;  %v438_v27 = vrot.slane %v437_v18, 2  ;;  %v487_v28 = vrot.slane %v486_v21, 4  ;;  %v470_v29 = vrot.slane %v469_v22, 4 }
 0x130   : > { %1099 = vpush %v356_v23  ;;  %v406_v30 = vrot.slane %v405_v19, 1  ;;  %v423_v31 = vrot.slane %v422_v20, 1 }
 0x131   : > { %v488_v32 = vadd.f32 %v487_v28, %v486_v21  ;;  %v471_v33 = vadd.f32 %v470_v29, %v469_v22  ;;  %1101 = vpush %v373_v24  ;;  %v439_v34 = vadd.f32 %v438_v27, %v437_v18  ;;  %v456_v35 = vadd.f32 %v455_v26, %v454_v17 }
 0x132   : > { %1103 = vpush %v390_v25  ;;  %v520_v36 = vpop.xlane.xlu1 %519  ;;  %v503_v37 = vpop.xlane.xlu0 %502  ;;  %v407_v40 = vadd.f32 %v406_v30, %v405_v19  ;;  %v424_v41 = vadd.f32 %v423_v31, %v422_v20 }
 0x133   : > { %v489_v42 = vrot.slane %v488_v32, 2  ;;  %v472_v43 = vrot.slane %v471_v33, 2  ;;  %v521_v44 = vrot.slane %v520_v36, 4  ;;  %v504_v38 = vrot.slane %v503_v37, 4 }
 0x134   : > { %1105 = vpush %v407_v40  ;;  %v440_v45 = vrot.slane %v439_v34, 1  ;;  %v457_v46 = vrot.slane %v456_v35, 1 }
 0x135   : > { %v522_v47 = vadd.f32 %v521_v44, %v520_v36  ;;  %v505_v48 = vadd.f32 %v504_v38, %v503_v37  ;;  %1107 = vpush %v424_v41  ;;  %v473_v49 = vadd.f32 %v472_v43, %v471_v33  ;;  %v490_v50 = vadd.f32 %v489_v42, %v488_v32 }
 0x136   : > { %v554_v51 = vpop.xlane.xlu1 %553  ;;  %v537_v52 = vpop.xlane.xlu0 %536  ;;  %v441_v39 = vadd.f32 %v440_v45, %v439_v34  ;;  %v458_v53 = vadd.f32 %v457_v46, %v456_v35 }
 0x137   : > { %v523_v54 = vrot.slane %v522_v47, 2  ;;  %v506_v55 = vrot.slane %v505_v48, 2  ;;  %v555_v56 = vrot.slane %v554_v51, 4  ;;  %v538_v57 = vrot.slane %v537_v52, 4 }
 0x138   : > { %1109 = vpush %v441_v39  ;;  %v474_v58 = vrot.slane %v473_v49, 1  ;;  %v491_v59 = vrot.slane %v490_v50, 1 }
 0x139   : > { %v556_v60 = vadd.f32 %v555_v56, %v554_v51  ;;  %v539_v61 = vadd.f32 %v538_v57, %v537_v52  ;;  %1111 = vpush %v458_v53  ;;  %v507_v62 = vadd.f32 %v506_v55, %v505_v48  ;;  %v524_v63 = vadd.f32 %v523_v54, %v522_v47 }
 0x13a   : > { %v588_v0 = vpop.xlane.xlu1 %587  ;;  %v571_v1 = vpop.xlane.xlu0 %570  ;;  %v475_v2 = vadd.f32 %v474_v58, %v473_v49  ;;  %v492_v3 = vadd.f32 %v491_v59, %v490_v50 }
 0x13b   : > { %v557_v4 = vrot.slane %v556_v60, 2  ;;  %v540_v5 = vrot.slane %v539_v61, 2  ;;  %v589_v6 = vrot.slane %v588_v0, 4  ;;  %v572_v7 = vrot.slane %v571_v1, 4 }
 0x13c   : > { %1113 = vpush %v475_v2  ;;  %v508_v8 = vrot.slane %v507_v62, 1  ;;  %v525_v9 = vrot.slane %v524_v63, 1 }
 0x13d   : > { %v590_v11 = vadd.f32 %v589_v6, %v588_v0  ;;  %v573_v12 = vadd.f32 %v572_v7, %v571_v1  ;;  %1115 = vpush %v492_v3  ;;  %v541_v13 = vadd.f32 %v540_v5, %v539_v61  ;;  %v558_v14 = vadd.f32 %v557_v4, %v556_v60 }
 0x13e   : > { %v622_v15 = vpop.xlane.xlu1 %621  ;;  %v605_v16 = vpop.xlane.xlu0 %604  ;;  %v509_v17 = vadd.f32 %v508_v8, %v507_v62  ;;  %v526_v18 = vadd.f32 %v525_v9, %v524_v63 }
 0x13f   : > { %v591_v19 = vrot.slane %v590_v11, 2  ;;  %v574_v20 = vrot.slane %v573_v12, 2  ;;  %v623_v21 = vrot.slane %v622_v15, 4  ;;  %v606_v22 = vrot.slane %v605_v16, 4 }
 0x140   : > { %1117 = vpush %v509_v17  ;;  %v542_v23 = vrot.slane %v541_v13, 1  ;;  %v559_v24 = vrot.slane %v558_v14, 1 }
 0x141   : > { %v624_v25 = vadd.f32 %v623_v21, %v622_v15  ;;  %v607_v26 = vadd.f32 %v606_v22, %v605_v16  ;;  %1119 = vpush %v526_v18  ;;  %v575_v27 = vadd.f32 %v574_v20, %v573_v12  ;;  %v592_v28 = vadd.f32 %v591_v19, %v590_v11 }
 0x142   : > { %v656_v29 = vpop.xlane.xlu1 %655  ;;  %v639_v30 = vpop.xlane.xlu0 %638  ;;  %v543_v31 = vadd.f32 %v542_v23, %v541_v13  ;;  %v560_v32 = vadd.f32 %v559_v24, %v558_v14 }
 0x143   : > { %v625_v33 = vrot.slane %v624_v25, 2  ;;  %v608_v34 = vrot.slane %v607_v26, 2  ;;  %v657_v35 = vrot.slane %v656_v29, 4  ;;  %v640_v36 = vrot.slane %v639_v30, 4 }
 0x144   : > { %1121 = vpush %v543_v31  ;;  %v576_v37 = vrot.slane %v575_v27, 1  ;;  %v593_v40 = vrot.slane %v592_v28, 1 }
 0x145   : > { %v658_v41 = vadd.f32 %v657_v35, %v656_v29  ;;  %v641_v42 = vadd.f32 %v640_v36, %v639_v30  ;;  %1123 = vpush %v560_v32  ;;  %v609_v43 = vadd.f32 %v608_v34, %v607_v26  ;;  %v626_v44 = vadd.f32 %v625_v33, %v624_v25 }
 0x146   : > { %v690_v38 = vpop.xlane.xlu1 %689  ;;  %v673_v45 = vpop.xlane.xlu0 %672  ;;  %v577_v46 = vadd.f32 %v576_v37, %v575_v27  ;;  %v594_v47 = vadd.f32 %v593_v40, %v592_v28 }
 0x147   : > { %v659_v48 = vrot.slane %v658_v41, 2  ;;  %v642_v49 = vrot.slane %v641_v42, 2  ;;  %v691_v50 = vrot.slane %v690_v38, 4  ;;  %v674_v51 = vrot.slane %v673_v45, 4 }
 0x148   : > { %1125 = vpush %v577_v46  ;;  %v610_v52 = vrot.slane %v609_v43, 1  ;;  %v627_v39 = vrot.slane %v626_v44, 1 }
 0x149   : > { %v692_v53 = vadd.f32 %v691_v50, %v690_v38  ;;  %v675_v54 = vadd.f32 %v674_v51, %v673_v45  ;;  %1127 = vpush %v594_v47  ;;  %v643_v55 = vadd.f32 %v642_v49, %v641_v42  ;;  %v660_v56 = vadd.f32 %v659_v48, %v658_v41 }
 0x14a   : > { %v724_v57 = vpop.xlane.xlu1 %723  ;;  %v707_v58 = vpop.xlane.xlu0 %706  ;;  %v611_v59 = vadd.f32 %v610_v52, %v609_v43  ;;  %v628_v60 = vadd.f32 %v627_v39, %v626_v44 }
 0x14b   : > { %v693_v61 = vrot.slane %v692_v53, 2  ;;  %v676_v62 = vrot.slane %v675_v54, 2  ;;  %v725_v63 = vrot.slane %v724_v57, 4  ;;  %v708_v0 = vrot.slane %v707_v58, 4 }
 0x14c   : > { %1129 = vpush %v611_v59  ;;  %v644_v1 = vrot.slane %v643_v55, 1  ;;  %v661_v2 = vrot.slane %v660_v56, 1 }
 0x14d   : > { %v726_v3 = vadd.f32 %v725_v63, %v724_v57  ;;  %v709_v4 = vadd.f32 %v708_v0, %v707_v58  ;;  %1131 = vpush %v628_v60  ;;  %v677_v5 = vadd.f32 %v676_v62, %v675_v54  ;;  %v694_v6 = vadd.f32 %v693_v61, %v692_v53 }
 0x14e   : > { %v758_v7 = vpop.xlane.xlu1 %757  ;;  %v741_v8 = vpop.xlane.xlu0 %740  ;;  %v645_v9 = vadd.f32 %v644_v1, %v643_v55  ;;  %v662_v11 = vadd.f32 %v661_v2, %v660_v56  ;;  %v1697_v54 = vand.u32 127, %v275_v10 }
 0x14f   : > { %v727_v12 = vrot.slane %v726_v3, 2  ;;  %v710_v13 = vrot.slane %v709_v4, 2  ;;  %v759_v14 = vrot.slane %v758_v7, 4  ;;  %v742_v15 = vrot.slane %v741_v8, 4 }
 0x150   : > { %1133 = vpush %v645_v9  ;;  %v678_v16 = vrot.slane %v677_v5, 1  ;;  %v695_v17 = vrot.slane %v694_v6, 1  ;;  %vm341_vm7 = vcmp.eq.s32.totalorder %v1697_v54, 0  ;;  %vm358_vm11 = vcmp.eq.s32.totalorder %v1697_v54, 1 }
 0x151   : > { %v760_v18 = vadd.f32 %v759_v14, %v758_v7  ;;  %v743_v19 = vadd.f32 %v742_v15, %v741_v8  ;;  %1135 = vpush %v662_v11  ;;  %v711_v20 = vadd.f32 %v710_v13, %v709_v4  ;;  %v728_v21 = vadd.f32 %v727_v12, %v726_v3 }
 0x152   : > { %v792_v22 = vpop.xlane.xlu1 %791  ;;  %v775_v23 = vpop.xlane.xlu0 %774  ;;  %v679_v24 = vadd.f32 %v678_v16, %v677_v5  ;;  %v696_v25 = vadd.f32 %v695_v17, %v694_v6  ;;  %vm375_vm12 = vcmp.eq.s32.totalorder %v1697_v54, 2  ;;  %vm392_vm13 = vcmp.eq.s32.totalorder %v1697_v54, 3 }
 0x153   : > { %v761_v26 = vrot.slane %v760_v18, 2  ;;  %v744_v27 = vrot.slane %v743_v19, 2  ;;  %v793_v28 = vrot.slane %v792_v22, 4  ;;  %v776_v29 = vrot.slane %v775_v23, 4 }
 0x154   : > { %1137 = vpush %v679_v24  ;;  %v712_v30 = vrot.slane %v711_v20, 1  ;;  %v729_v31 = vrot.slane %v728_v21, 1  ;;  %vm409_vm14 = vcmp.eq.s32.totalorder %v1697_v54, 4  ;;  %vm426_vm15 = vcmp.eq.s32.totalorder %v1697_v54, 5 }
 0x155   : > { %v794_v32 = vadd.f32 %v793_v28, %v792_v22  ;;  %v777_v33 = vadd.f32 %v776_v29, %v775_v23  ;;  %1139 = vpush %v696_v25  ;;  %v745_v34 = vadd.f32 %v744_v27, %v743_v19  ;;  %v762_v35 = vadd.f32 %v761_v26, %v760_v18 }
 0x156   : > { %v826_v36 = vpop.xlane.xlu1 %825  ;;  %v809_v37 = vpop.xlane.xlu0 %808  ;;  %v713_v40 = vadd.f32 %v712_v30, %v711_v20  ;;  %v730_v41 = vadd.f32 %v729_v31, %v728_v21  ;;  %vm443_vm0 = vcmp.eq.s32.totalorder %v1697_v54, 6  ;;  %vm460_vm1 = vcmp.eq.s32.totalorder %v1697_v54, 7 }
 0x157   : > { %v795_v42 = vrot.slane %v794_v32, 2  ;;  %v778_v43 = vrot.slane %v777_v33, 2  ;;  %v827_v44 = vrot.slane %v826_v36, 4  ;;  %v810_v38 = vrot.slane %v809_v37, 4 }
 0x158   : > { %1141 = vpush %v713_v40  ;;  %v746_v45 = vrot.slane %v745_v34, 1  ;;  %v763_v46 = vrot.slane %v762_v35, 1  ;;  %vm477_vm2 = vcmp.eq.s32.totalorder %v1697_v54, 8  ;;  %vm494_vm3 = vcmp.eq.s32.totalorder %v1697_v54, 9 }
 0x159   : > { %v828_v47 = vadd.f32 %v827_v44, %v826_v36  ;;  %v811_v48 = vadd.f32 %v810_v38, %v809_v37  ;;  %1143 = vpush %v730_v41  ;;  %v779_v49 = vadd.f32 %v778_v43, %v777_v33  ;;  %v796_v50 = vadd.f32 %v795_v42, %v794_v32 }
 0x15a   : > { %v860_v51 = vpop.xlane.xlu1 %859  ;;  %v843_v52 = vpop.xlane.xlu0 %842  ;;  %v747_v39 = vadd.f32 %v746_v45, %v745_v34  ;;  %v764_v53 = vadd.f32 %v763_v46, %v762_v35  ;;  %vm511_vm4 = vcmp.eq.s32.totalorder %v1697_v54, 10  ;;  %vm528_vm5 = vcmp.eq.s32.totalorder %v1697_v54, 11 }
 0x15b   : > { %v829_v55 = vrot.slane %v828_v47, 2  ;;  %v812_v56 = vrot.slane %v811_v48, 2  ;;  %v861_v57 = vrot.slane %v860_v51, 4  ;;  %v844_v58 = vrot.slane %v843_v52, 4 }
 0x15c   : > { %1145 = vpush %v747_v39  ;;  %v780_v59 = vrot.slane %v779_v49, 1  ;;  %v797_v60 = vrot.slane %v796_v50, 1  ;;  %vm545_vm6 = vcmp.eq.s32.totalorder %v1697_v54, 12  ;;  %vm562_vm8 = vcmp.eq.s32.totalorder %v1697_v54, 13 }
 0x15d   : > { %v862_v61 = vadd.f32 %v861_v57, %v860_v51  ;;  %v845_v62 = vadd.f32 %v844_v58, %v843_v52  ;;  %1147 = vpush %v764_v53  ;;  %s1098_s0 = spop %1097  ;;  %v813_v63 = vadd.f32 %v812_v56, %v811_v48  ;;  %v830_v0 = vadd.f32 %v829_v55, %v828_v47 }
 0x15e   : > { %v877_v1 = vpop.xlane.xlu0 %876  ;;  %v781_v2 = vadd.f32 %v780_v59, %v779_v49  ;;  %v798_v3 = vadd.f32 %v797_v60, %v796_v50  ;;  %v342_v5 = vstv %s1098_s0  ;;  %vm579_vm9 = vcmp.eq.s32.totalorder %v1697_v54, 14 }
 0x15f   : > { %v863_v10 = vrot.slane %v862_v61, 2  ;;  %v846_v4 = vrot.slane %v845_v62, 2  ;;  %v878_v6 = vrot.slane %v877_v1, 4  ;;  %v814_v7 = vrot.slane %v813_v63, 1 }
 0x160   : > { %1149 = vpush %v781_v2  ;;  %v831_v8 = vrot.slane %v830_v0, 1  ;;  %v343_v13 = vsel %vm341_vm7, %v342_v5, 0.0  ;;  %vm596_vm10 = vcmp.eq.s32.totalorder %v1697_v54, 15  ;;  %vm613_vm7 = vcmp.eq.s32.totalorder %v1697_v54, 16 }
 0x161   : > { %v864_v9 = vadd.f32 %v863_v10, %v862_v61  ;;  %v879_v11 = vadd.f32 %v878_v6, %v877_v1  ;;  %1151 = vpush %v798_v3  ;;  %s1100_s29 = spop %1099  ;;  %v847_v12 = vadd.f32 %v846_v4, %v845_v62  ;;  %v815_v15 = vadd.f32 %v814_v7, %v813_v63 }
 0x162   : > { %v359_v14 = vstv %s1100_s29  ;;  %s1102_s28 = spop %1101  ;;  %v832_v16 = vadd.f32 %v831_v8, %v830_v0 }
 0x163   : > { %v880_v17 = vrot.slane %v879_v11, 2  ;;  %v360_v18 = vsel %vm358_vm11, %v359_v14, 0.0  ;;  %v376_v19 = vstv %s1102_s28  ;;  %s1104_s25 = spop %1103  ;;  %v848_v20 = vrot.slane %v847_v12, 1  ;;  %1153 = vpush %v815_v15 }
 0x164   : > { %v361_v21 = vadd.f32 %v360_v18, %v343_v13  ;;  %v393_v22 = vstv %s1104_s25  ;;  %v865_v23 = vrot.slane %v864_v9, 1  ;;  %v377_v25 = vsel %vm375_vm12, %v376_v19, 0.0  ;;  %1155 = vpush %v832_v16 }
 0x165   : > { %v881_v24 = vadd.f32 %v880_v17, %v879_v11  ;;  %s1106_s4 = spop %1105  ;;  %v849_v26 = vadd.f32 %v848_v20, %v847_v12  ;;  %v394_v30 = vsel %vm392_vm13, %v393_v22, 0.0  ;;  %vm630_vm11 = vcmp.eq.s32.totalorder %v1697_v54, 17 }
 0x166   : > { %v378_v27 = vadd.f32 %v377_v25, %v361_v21  ;;  %v410_v28 = vstv %s1106_s4  ;;  %s1108_s6 = spop %1107  ;;  %v866_v29 = vadd.f32 %v865_v23, %v864_v9  ;;  %vm647_vm12 = vcmp.eq.s32.totalorder %v1697_v54, 18 }
 0x167   : > { %1157 = vpush %v849_v26  ;;  %v882_v31 = vrot.slane %v881_v24, 1  ;;  %v427_v33 = vstv %s1108_s6  ;;  %v411_v34 = vsel %vm409_vm14, %v410_v28, 0.0  ;;  %vm664_vm13 = vcmp.eq.s32.totalorder %v1697_v54, 19 }
 0x168   : > { %v395_v32 = vadd.f32 %v394_v30, %v378_v27  ;;  %1159 = vpush %v866_v29  ;;  %v428_v40 = vsel %vm426_vm15, %v427_v33, 0.0  ;;  %vm681_vm14 = vcmp.eq.s32.totalorder %v1697_v54, 20  ;;  %vm698_vm15 = vcmp.eq.s32.totalorder %v1697_v54, 21 }
 0x169   : > { %s1110_s8 = spop %1109  ;;  %v883_v35 = vadd.f32 %v882_v31, %v881_v24 }
 0x16a   : > { %v412_v36 = vadd.f32 %v411_v34, %v395_v32  ;;  %v444_v37 = vstv %s1110_s8  ;;  %s1112_s10 = spop %1111 }
 0x16b   : > { %1161 = vpush %v883_v35  ;;  %v461_v42 = vstv %s1112_s10  ;;  %v445_v43 = vsel %vm443_vm0, %v444_v37, 0.0  ;;  %vm715_vm0 = vcmp.eq.s32.totalorder %v1697_v54, 22 }
 0x16c   : > { %v429_v41 = vadd.f32 %v428_v40, %v412_v36  ;;  %v462_v45 = vsel %vm460_vm1, %v461_v42, 0.0  ;;  %vm732_vm1 = vcmp.eq.s32.totalorder %v1697_v54, 23 }
 0x16d   : > { %s1114_s9 = spop %1113 }
 0x16e   : > { %v446_v44 = vadd.f32 %v445_v43, %v429_v41  ;;  %v478_v38 = vstv %s1114_s9  ;;  %s1116_s12 = spop %1115  ;;  %s1057_s9 = sshll.u32 %s1371_s16, 1 }
 0x16f   : > { %v495_v47 = vstv %s1116_s12  ;;  %v479_v48 = vsel %vm477_vm2, %v478_v38, 0.0  ;;  %vm749_vm2 = vcmp.eq.s32.totalorder %v1697_v54, 24 }
 0x170   : > { %v463_v46 = vadd.f32 %v462_v45, %v446_v44  ;;  %v496_v51 = vsel %vm494_vm3, %v495_v47, 0.0  ;;  %vm766_vm3 = vcmp.eq.s32.totalorder %v1697_v54, 25 }
 0x171   : > { %s1118_s20 = spop %1117 }
 0x172   : > { %v480_v49 = vadd.f32 %v479_v48, %v463_v46  ;;  %v512_v50 = vstv %s1118_s20  ;;  %s1120_s21 = spop %1119 }
 0x173   : > { %v529_v39 = vstv %s1120_s21  ;;  %v513_v53 = vsel %vm511_vm4, %v512_v50, 0.0  ;;  %vm783_vm4 = vcmp.eq.s32.totalorder %v1697_v54, 26  ;;  %s268_s21 = sadd.s32 %s1367_s15, %s1057_s9 }
 0x174   : > { %v497_v52 = vadd.f32 %v496_v51, %v480_v49  ;;  %v530_v57 = vsel %vm528_vm5, %v529_v39, 0.0  ;;  %vm800_vm5 = vcmp.eq.s32.totalorder %v1697_v54, 27  ;;  %p269_p5 = scmp.lt.s32.totalorder %s268_s21, 3 }
 0x175   : > { %s1122_s22 = spop %1121 }
 0x176   : > { %v514_v55 = vadd.f32 %v513_v53, %v497_v52  ;;  %v546_v56 = vstv %s1122_s22  ;;  %s1124_s26 = spop %1123  ;;  %s1800_s21 = smov (!%p269_p5, %s268_s21), 3 }
 0x177   : > { %v563_v59 = vstv %s1124_s26  ;;  %v547_v60 = vsel %vm545_vm6, %v546_v56, 0.0  ;;  %vm817_vm6 = vcmp.eq.s32.totalorder %v1697_v54, 28 }
 0x178   : > { %v531_v58 = vadd.f32 %v530_v57, %v514_v55  ;;  %v564_v63 = vsel %vm562_vm8, %v563_v59, 0.0  ;;  %vm834_vm8 = vcmp.eq.s32.totalorder %v1697_v54, 29 }
 0x179   : > { %s1126_s30 = spop %1125 }
 0x17a   : > { %v548_v61 = vadd.f32 %v547_v60, %v531_v58  ;;  %v580_v62 = vstv %s1126_s30  ;;  %s1128_s7 = spop %1127 }
 0x17b   : > { %v597_v1 = vstv %s1128_s7  ;;  %v581_v2 = vsel %vm579_vm9, %v580_v62, 0.0  ;;  %vm851_vm9 = vcmp.eq.s32.totalorder %v1697_v54, 30  ;;  %s271_s7 = scalar_lea.vmem %s1768_s3, %s1800_s21 }
 0x17c   : > { %v565_v0 = vadd.f32 %v564_v63, %v548_v61  ;;  %v598_v4 = vsel %vm596_vm10, %v597_v1, 0.0  ;;  %vm868_vm10 = vcmp.eq.s32.totalorder %v1697_v54, 31 }
 0x17d   : > { %s1130_s23 = spop %1129 }
 0x17e   : > { %v582_v3 = vadd.f32 %v581_v2, %v565_v0  ;;  %v614_v10 = vstv %s1130_s23  ;;  %s1132_s11 = spop %1131 }
 0x17f   : > { %v631_v6 = vstv %s1132_s11  ;;  %v615_v7 = vsel %vm613_vm7, %v614_v10, 0.0  ;;  %vm885_vm7 = vcmp.eq.s32.totalorder %v1697_v54, 32 }
 0x180   : > { %v599_v5 = vadd.f32 %v598_v4, %v582_v3  ;;  %v632_v11 = vsel %vm630_vm11, %v631_v6, 0.0 }
 0x181   : > { %s1134_s24 = spop %1133 }
 0x182   : > { %v616_v8 = vadd.f32 %v615_v7, %v599_v5  ;;  %v648_v9 = vstv %s1134_s24  ;;  %s1136_s27 = spop %1135 }
 0x183   : > { %v665_v13 = vstv %s1136_s27  ;;  %v649_v14 = vsel %vm647_vm12, %v648_v9, 0.0 }
 0x184   : > { %v633_v12 = vadd.f32 %v632_v11, %v616_v8  ;;  %v666_v17 = vsel %vm664_vm13, %v665_v13, 0.0 }
 0x185   : > { %s1138_s0 = spop %1137 }
 0x186   : > { %v650_v15 = vadd.f32 %v649_v14, %v633_v12  ;;  %v682_v16 = vstv %s1138_s0  ;;  %s1140_s29 = spop %1139 }
 0x187   : > { %v699_v19 = vstv %s1140_s29  ;;  %v683_v20 = vsel %vm681_vm14, %v682_v16, 0.0 }
 0x188   : > { %v667_v18 = vadd.f32 %v666_v17, %v650_v15  ;;  %v700_v23 = vsel %vm698_vm15, %v699_v19, 0.0 }
 0x189   : > { %s1142_s28 = spop %1141 }
 0x18a   : > { %v684_v21 = vadd.f32 %v683_v20, %v667_v18  ;;  %v716_v22 = vstv %s1142_s28  ;;  %s1144_s25 = spop %1143 }
 0x18b   : > { %v733_v25 = vstv %s1144_s25  ;;  %v717_v26 = vsel %vm715_vm0, %v716_v22, 0.0 }
 0x18c   : > { %v701_v24 = vadd.f32 %v700_v23, %v684_v21  ;;  %v734_v29 = vsel %vm732_vm1, %v733_v25, 0.0 }
 0x18d   : > { %s1146_s4 = spop %1145 }
 0x18e   : > { %v718_v27 = vadd.f32 %v717_v26, %v701_v24  ;;  %v750_v28 = vstv %s1146_s4  ;;  %s1148_s6 = spop %1147 }
 0x18f   : > { %v767_v31 = vstv %s1148_s6  ;;  %v751_v32 = vsel %vm749_vm2, %v750_v28, 0.0 }
 0x190   : > { %v735_v30 = vadd.f32 %v734_v29, %v718_v27  ;;  %v768_v35 = vsel %vm766_vm3, %v767_v31, 0.0 }
 0x191   : > { %s1150_s8 = spop %1149 }
 0x192   : > { %v752_v33 = vadd.f32 %v751_v32, %v735_v30  ;;  %v784_v34 = vstv %s1150_s8  ;;  %s1152_s10 = spop %1151 }
 0x193   : > { %v801_v37 = vstv %s1152_s10  ;;  %v785_v40 = vsel %vm783_vm4, %v784_v34, 0.0 }
 0x194   : > { %v769_v36 = vadd.f32 %v768_v35, %v752_v33  ;;  %s1154_s12 = spop %1153  ;;  %v802_v43 = vsel %vm800_vm5, %v801_v37, 0.0 }
 0x195   : > { %v818_v42 = vstv %s1154_s12  ;;  %s1156_s20 = spop %1155 }
 0x196   : > { %v786_v41 = vadd.f32 %v785_v40, %v769_v36  ;;  %v835_v38 = vstv %s1156_s20  ;;  %v819_v45 = vsel %vm817_vm6, %v818_v42, 0.0 }
 0x197   : > { %v836_v48 = vsel %vm834_vm8, %v835_v38, 0.0 }
 0x198   : > { %v803_v44 = vadd.f32 %v802_v43, %v786_v41  ;;  %s1158_s22 = spop %1157 }
 0x199   : > { %s1160_s16 = spop %1159  ;;  %v852_v47 = vstv %s1158_s22 }
 0x19a   : > { %v820_v46 = vadd.f32 %v819_v45, %v803_v44  ;;  %v869_v50 = vstv %s1160_s16  ;;  %v853_v51 = vsel %vm851_vm9, %v852_v47, 0.0 }
 0x19b   : > { %v870_v53 = vsel %vm868_vm10, %v869_v50, 0.0 }
 0x19c   : > { %v837_v49 = vadd.f32 %v836_v48, %v820_v46  ;;  %s1162_s26 = spop %1161 }
 0x19d   : > { %v886_v39 = vstv %s1162_s26 }
 0x19e   : > { %v854_v52 = vadd.f32 %v853_v51, %v837_v49  ;;  %v887_v56 = vsel %vm885_vm7, %v886_v39, 0.0 }
 0x1a0   : > { %v871_v55 = vadd.f32 %v870_v53, %v854_v52 }
 0x1a2   : > { %v888_v57 = vadd.f32 %v887_v56, %v871_v55 }
 0x1a4   : > { %889 = vst [vmem:[%s271_s7] sm:$0x1] %v888_v57 }
 0x1a5 PF: > { %s20_s19 = sadd.s32 1, %s1383_s19   ;;  %s1784_s23 = sld [smem:[#allocation8_spill]] }
 0x1a6   : > { %p17_p9 = scmp.ge.s32.totalorder %s20_s19, 6   ;;  %s1785_s11 = sld [smem:[#allocation9_spill]] }
 0x1a7   : > { %s1786_s12 = smov %s1359_s13  ;;  %s1787_s13 = smov %s1363_s14 }
 0x1a8   : > { %s1788_s14 = smov %s1481_s5  ;;  %s1789_s15 = smov %s1375_s17 }
 0x1a9   : > { %s1790_s16 = smov %s1379_s18  ;;  %19 = sbr.rel (!%p17_p9) target bundleno = 9 (0x9), region = 96 }
 0x1ab   : > { %s1791_s17 = smov %s1784_s23 }
 0x1ac   : > { %s1792_s18 = smov %s1785_s11 }
 0x1b0   :  { %935 = vsyncpa [#allocation3], 1 }
 0x1b1   :  { %937 = vsyncpa [#allocation3 + $0x1], 1 }
 0x1b2   :  { %938 = vsyncpa [#allocation5], 1 }
 0x1b3   :  { %940 = vsyncpa [#allocation5 + $0x1], 1 }

</bundles_post_ra>
